<compile_context>
chip_gen: v7x
topology: tpu7x:2x2x1
jax: 0.10.0
libtpu: 0.0.40
codegen_flags: <defaults>
</compile_context>

<pallas_src>
import numpy as np
import jax
import jax.numpy as jnp
from jax.experimental import pallas as pl
from jax.experimental.pallas import tpu as pltpu


def _dwconv3x3_kernel(x_ref, w_ref, b_ref, o_ref, pad_ref):
    """One (batch, channel-block) step of a depthwise 3x3 'same' conv.

    x_ref  : (1, H, W, BC)   input tile (NHWC)
    w_ref  : (3, 3, BC)      depthwise taps
    b_ref  : (1, 1, BC)      bias
    o_ref  : (1, H, W, BC)   output tile
    pad_ref: (H+2, W+2, BC)  f32 zero-padded scratch
    """
    _, H, W, BC = o_ref.shape

    # Clear only the 1-wide halo border (the interior is fully overwritten
    # below).  Done every step instead of under pl.when(program_id == 0) so
    # the scratch is valid on every TensorCore when the grid is split across
    # cores; it is still far cheaper than re-zeroing the whole scratch.
    zrow = jnp.zeros((1, W + 2, BC), jnp.float32)
    pad_ref[0:1, :, :] = zrow
    pad_ref[H + 1:H + 2, :, :] = zrow
    zcol = jnp.zeros((H, 1, BC), jnp.float32)
    pad_ref[1:H + 1, 0:1, :] = zcol
    pad_ref[1:H + 1, W + 1:W + 2, :] = zcol

    # Interior <- input tile.
    pad_ref[1:H + 1, 1:W + 1, :] = x_ref[0].astype(jnp.float32)

    w = w_ref[...].astype(jnp.float32)                       # (3, 3, BC)
    acc = jnp.zeros((H, W, BC), jnp.float32) + b_ref[...].astype(jnp.float32)

    # dx-major: slice the W-shifted column slab once per dx (only dx=1,2 are
    # unaligned sublane slices), then the three dy taps are major-axis slices.
    for dx in range(3):
        cols = pad_ref[:, dx:dx + W, :]                      # (H+2, W, BC)
        for dy in range(3):
            acc = acc + cols[dy:dy + H] * w[dy:dy + 1, dx:dx + 1, :]

    o_ref[0] = acc.astype(o_ref.dtype)


def dwconv3x3(x_nhwc, w, b, *, block_c=128):
    """Depthwise Conv2d(dim, dim, 3, stride=1, padding=1, groups=dim) on NHWC.

    x_nhwc: (B, H, W, C); w: (3, 3, C); b: (C,).  Returns (B, H, W, C).
    """
    B, H, W, C = x_nhwc.shape
    assert w.shape == (3, 3, C) and b.shape == (C,)
    bc = min(block_c, C)
    assert C % bc == 0, "channel count must be divisible by the channel block"
    grid = (B, C // bc)

    # TODO(synk): for very large spatial sizes (e.g. 224x224) the per-step
    # (1, H, W, bc) block should additionally be row-tiled with a 1-row halo
    # (manual DMA from a pl.ANY ref) to keep double-buffered blocks well
    # inside v7x's 64 MiB VMEM.
    return pl.pallas_call(
        _dwconv3x3_kernel,
        out_shape=jax.ShapeDtypeStruct((B, H, W, C), x_nhwc.dtype),
        grid=grid,
        in_specs=[
            pl.BlockSpec((1, H, W, bc), lambda i, j: (i, 0, 0, j)),
            pl.BlockSpec((3, 3, bc), lambda i, j: (0, 0, j)),
            pl.BlockSpec((1, 1, bc), lambda i, j: (0, 0, j)),
        ],
        out_specs=pl.BlockSpec((1, H, W, bc), lambda i, j: (i, 0, 0, j)),
        scratch_shapes=[pltpu.VMEM((H + 2, W + 2, bc), jnp.float32)],
        compiler_params=pltpu.CompilerParams(
            dimension_semantics=("parallel", "parallel")),
    )(x_nhwc, w, b.reshape(1, 1, C))


# ------------------------------ pure-JAX reference ---------------------------


def dwconv3x3_reference(x_nhwc, w, b):
    B, H, W, C = x_nhwc.shape
    xp = jnp.pad(x_nhwc.astype(jnp.float32), ((0, 0), (1, 1), (1, 1), (0, 0)))
    out = jnp.zeros((B, H, W, C), jnp.float32) + b.astype(jnp.float32)
    for dy in range(3):
        for dx in range(3):
            out = out + xp[:, dy:dy + H, dx:dx + W, :] * w[dy, dx].astype(jnp.float32)
    return out.astype(x_nhwc.dtype)


# ----------------------------------- main ------------------------------------


if __name__ == "__main__":
    key = jax.random.PRNGKey(0)

    def run_case(B, H, W, C):
        kx, kw, kb = jax.random.split(jax.random.fold_in(key, 1000 * H + C), 3)
        x = jax.random.normal(kx, (B, H, W, C), jnp.float32)
        w = jax.random.normal(kw, (3, 3, C), jnp.float32) * 0.2
        b = jax.random.normal(kb, (C,), jnp.float32) * 0.1
        out = jax.block_until_ready(jax.jit(dwconv3x3)(x, w, b))
        assert out.shape == (B, H, W, C)
        ref = dwconv3x3_reference(x, w, b)
        np.testing.assert_allclose(np.asarray(out), np.asarray(ref),
                                   rtol=1e-5, atol=1e-5)

    # Lane-dense main case (C is a multiple of 128 -> unmasked vector stores).
    run_case(B=2, H=16, W=16, C=128)
    # Small-channel case (channel block falls back to the full C = 64).
    run_case(B=2, H=8, W=8, C=64)

    print("KERNEL_OK")
</pallas_src>

<mosaic_0001>
module attributes {stable_mosaic.version = 11 : i64} {
  func.func @_dwconv3x3_kernel(%arg0: i32, %arg1: i32, %arg2: memref<1x16x16x128xf32, #tpu.memory_space<vmem>>, %arg3: memref<3x3x128xf32, #tpu.memory_space<vmem>>, %arg4: memref<1x1x128xf32, #tpu.memory_space<vmem>>, %arg5: memref<1x16x16x128xf32, #tpu.memory_space<vmem>>, %arg6: memref<18x18x128xf32, #tpu.memory_space<vmem>>) attributes {dimension_semantics = [#tpu.dimension_semantics<parallel>, #tpu.dimension_semantics<parallel>], iteration_bounds = array<i64: 2, 1>, scalar_prefetch = 0 : i64, scratch_operands = 1 : i64, tpu.core_type = #tpu.core_type<tc>, window_params = [{transform_indices = @transform_0, window_bounds = array<i64: 1, 16, 16, 128>}, {transform_indices = @transform_1, window_bounds = array<i64: 3, 3, 128>}, {transform_indices = @transform_2, window_bounds = array<i64: 1, 1, 128>}, {transform_indices = @transform_3, window_bounds = array<i64: 1, 16, 16, 128>}]} {
    %cst = arith.constant 0.000000e+00 : f32
    %0 = vector.broadcast %cst : f32 to vector<1x18x128xf32>
    %c0 = arith.constant 0 : index
    %c0_0 = arith.constant 0 : index
    %c0_1 = arith.constant 0 : index
    %1 = vector.load %arg6[%c0, %c0_0, %c0_1] : memref<18x18x128xf32, #tpu.memory_space<vmem>>, vector<1x18x128xf32>
    tpu.vector_store %arg6[%c0, %c0_0, %c0_1], %0 {strides = array<i32>} : memref<18x18x128xf32, #tpu.memory_space<vmem>>, vector<1x18x128xf32>,
    %c17 = arith.constant 17 : index
    %c0_2 = arith.constant 0 : index
    %c0_3 = arith.constant 0 : index
    %2 = vector.load %arg6[%c17, %c0_2, %c0_3] : memref<18x18x128xf32, #tpu.memory_space<vmem>>, vector<1x18x128xf32>
    tpu.vector_store %arg6[%c17, %c0_2, %c0_3], %0 {strides = array<i32>} : memref<18x18x128xf32, #tpu.memory_space<vmem>>, vector<1x18x128xf32>,
    %cst_4 = arith.constant 0.000000e+00 : f32
    %3 = vector.broadcast %cst_4 : f32 to vector<16x1x128xf32>
    %c1 = arith.constant 1 : index
    %c0_5 = arith.constant 0 : index
    %c0_6 = arith.constant 0 : index
    %4 = vector.load %arg6[%c1, %c0_5, %c0_6] : memref<18x18x128xf32, #tpu.memory_space<vmem>>, vector<16x1x128xf32>
    tpu.vector_store %arg6[%c1, %c0_5, %c0_6], %3 {strides = array<i32>} : memref<18x18x128xf32, #tpu.memory_space<vmem>>, vector<16x1x128xf32>,
    %c1_7 = arith.constant 1 : index
    %c17_8 = arith.constant 17 : index
    %c0_9 = arith.constant 0 : index
    %5 = vector.load %arg6[%c1_7, %c17_8, %c0_9] : memref<18x18x128xf32, #tpu.memory_space<vmem>>, vector<16x1x128xf32>
    tpu.vector_store %arg6[%c1_7, %c17_8, %c0_9], %3 {strides = array<i32>} : memref<18x18x128xf32, #tpu.memory_space<vmem>>, vector<16x1x128xf32>,
    %c0_10 = arith.constant 0 : index
    %c0_11 = arith.constant 0 : index
    %c0_12 = arith.constant 0 : index
    %c0_13 = arith.constant 0 : index
    %6 = vector.load %arg2[%c0_10, %c0_11, %c0_12, %c0_13] : memref<1x16x16x128xf32, #tpu.memory_space<vmem>>, vector<1x16x16x128xf32>
    %7 = vector.shape_cast %6 : vector<1x16x16x128xf32> to vector<16x16x128xf32>
    %c1_14 = arith.constant 1 : index
    %c1_15 = arith.constant 1 : index
    %c0_16 = arith.constant 0 : index
    %8 = vector.load %arg6[%c1_14, %c1_15, %c0_16] : memref<18x18x128xf32, #tpu.memory_space<vmem>>, vector<16x16x128xf32>
    tpu.vector_store %arg6[%c1_14, %c1_15, %c0_16], %7 {strides = array<i32>} : memref<18x18x128xf32, #tpu.memory_space<vmem>>, vector<16x16x128xf32>,
    %c0_17 = arith.constant 0 : index
    %c0_18 = arith.constant 0 : index
    %c0_19 = arith.constant 0 : index
    %9 = vector.load %arg3[%c0_17, %c0_18, %c0_19] : memref<3x3x128xf32, #tpu.memory_space<vmem>>, vector<3x3x128xf32>
    %cst_20 = arith.constant 0.000000e+00 : f32
    %10 = vector.broadcast %cst_20 : f32 to vector<16x16x128xf32>
    %c0_21 = arith.constant 0 : index
    %c0_22 = arith.constant 0 : index
    %c0_23 = arith.constant 0 : index
    %11 = vector.load %arg4[%c0_21, %c0_22, %c0_23] : memref<1x1x128xf32, #tpu.memory_space<vmem>>, vector<1x1x128xf32>
    %12 = vector.broadcast %11 : vector<1x1x128xf32> to vector<16x16x128xf32>
    %13 = arith.addf %10, %12 : vector<16x16x128xf32>
    %c0_24 = arith.constant 0 : index
    %c0_25 = arith.constant 0 : index
    %c0_26 = arith.constant 0 : index
    %14 = vector.load %arg6[%c0_24, %c0_25, %c0_26] : memref<18x18x128xf32, #tpu.memory_space<vmem>>, vector<18x16x128xf32>
    %15 = vector.extract_strided_slice %14 {offsets = [0, 0, 0], sizes = [16, 16, 128], strides = [1, 1, 1]} : vector<18x16x128xf32> to vector<16x16x128xf32>
    %16 = vector.extract_strided_slice %9 {offsets = [0, 0, 0], sizes = [1, 1, 128], strides = [1, 1, 1]} : vector<3x3x128xf32> to vector<1x1x128xf32>
    %17 = vector.broadcast %16 : vector<1x1x128xf32> to vector<16x16x128xf32>
    %18 = arith.mulf %15, %17 : vector<16x16x128xf32>
    %19 = arith.addf %13, %18 : vector<16x16x128xf32>
    %20 = vector.extract_strided_slice %14 {offsets = [1, 0, 0], sizes = [16, 16, 128], strides = [1, 1, 1]} : vector<18x16x128xf32> to vector<16x16x128xf32>
    %21 = vector.extract_strided_slice %9 {offsets = [1, 0, 0], sizes = [1, 1, 128], strides = [1, 1, 1]} : vector<3x3x128xf32> to vector<1x1x128xf32>
    %22 = vector.broadcast %21 : vector<1x1x128xf32> to vector<16x16x128xf32>
    %23 = arith.mulf %20, %22 : vector<16x16x128xf32>
    %24 = arith.addf %19, %23 : vector<16x16x128xf32>
    %25 = vector.extract_strided_slice %14 {offsets = [2, 0, 0], sizes = [16, 16, 128], strides = [1, 1, 1]} : vector<18x16x128xf32> to vector<16x16x128xf32>
    %26 = vector.extract_strided_slice %9 {offsets = [2, 0, 0], sizes = [1, 1, 128], strides = [1, 1, 1]} : vector<3x3x128xf32> to vector<1x1x128xf32>
    %27 = vector.broadcast %26 : vector<1x1x128xf32> to vector<16x16x128xf32>
    %28 = arith.mulf %25, %27 : vector<16x16x128xf32>
    %29 = arith.addf %24, %28 : vector<16x16x128xf32>
    %c0_27 = arith.constant 0 : index
    %c1_28 = arith.constant 1 : index
    %c0_29 = arith.constant 0 : index
    %30 = vector.load %arg6[%c0_27, %c1_28, %c0_29] : memref<18x18x128xf32, #tpu.memory_space<vmem>>, vector<18x16x128xf32>
    %31 = vector.extract_strided_slice %30 {offsets = [0, 0, 0], sizes = [16, 16, 128], strides = [1, 1, 1]} : vector<18x16x128xf32> to vector<16x16x128xf32>
    %32 = vector.extract_strided_slice %9 {offsets = [0, 1, 0], sizes = [1, 1, 128], strides = [1, 1, 1]} : vector<3x3x128xf32> to vector<1x1x128xf32>
    %33 = vector.broadcast %32 : vector<1x1x128xf32> to vector<16x16x128xf32>
    %34 = arith.mulf %31, %33 : vector<16x16x128xf32>
    %35 = arith.addf %29, %34 : vector<16x16x128xf32>
    %36 = vector.extract_strided_slice %30 {offsets = [1, 0, 0], sizes = [16, 16, 128], strides = [1, 1, 1]} : vector<18x16x128xf32> to vector<16x16x128xf32>
    %37 = vector.extract_strided_slice %9 {offsets = [1, 1, 0], sizes = [1, 1, 128], strides = [1, 1, 1]} : vector<3x3x128xf32> to vector<1x1x128xf32>
    %38 = vector.broadcast %37 : vector<1x1x128xf32> to vector<16x16x128xf32>
    %39 = arith.mulf %36, %38 : vector<16x16x128xf32>
    %40 = arith.addf %35, %39 : vector<16x16x128xf32>
    %41 = vector.extract_strided_slice %30 {offsets = [2, 0, 0], sizes = [16, 16, 128], strides = [1, 1, 1]} : vector<18x16x128xf32> to vector<16x16x128xf32>
    %42 = vector.extract_strided_slice %9 {offsets = [2, 1, 0], sizes = [1, 1, 128], strides = [1, 1, 1]} : vector<3x3x128xf32> to vector<1x1x128xf32>
    %43 = vector.broadcast %42 : vector<1x1x128xf32> to vector<16x16x128xf32>
    %44 = arith.mulf %41, %43 : vector<16x16x128xf32>
    %45 = arith.addf %40, %44 : vector<16x16x128xf32>
    %c0_30 = arith.constant 0 : index
    %c2 = arith.constant 2 : index
    %c0_31 = arith.constant 0 : index
    %46 = vector.load %arg6[%c0_30, %c2, %c0_31] : memref<18x18x128xf32, #tpu.memory_space<vmem>>, vector<18x16x128xf32>
    %47 = vector.extract_strided_slice %46 {offsets = [0, 0, 0], sizes = [16, 16, 128], strides = [1, 1, 1]} : vector<18x16x128xf32> to vector<16x16x128xf32>
    %48 = vector.extract_strided_slice %9 {offsets = [0, 2, 0], sizes = [1, 1, 128], strides = [1, 1, 1]} : vector<3x3x128xf32> to vector<1x1x128xf32>
    %49 = vector.broadcast %48 : vector<1x1x128xf32> to vector<16x16x128xf32>
    %50 = arith.mulf %47, %49 : vector<16x16x128xf32>
    %51 = arith.addf %45, %50 : vector<16x16x128xf32>
    %52 = vector.extract_strided_slice %46 {offsets = [1, 0, 0], sizes = [16, 16, 128], strides = [1, 1, 1]} : vector<18x16x128xf32> to vector<16x16x128xf32>
    %53 = vector.extract_strided_slice %9 {offsets = [1, 2, 0], sizes = [1, 1, 128], strides = [1, 1, 1]} : vector<3x3x128xf32> to vector<1x1x128xf32>
    %54 = vector.broadcast %53 : vector<1x1x128xf32> to vector<16x16x128xf32>
    %55 = arith.mulf %52, %54 : vector<16x16x128xf32>
    %56 = arith.addf %51, %55 : vector<16x16x128xf32>
    %57 = vector.extract_strided_slice %46 {offsets = [2, 0, 0], sizes = [16, 16, 128], strides = [1, 1, 1]} : vector<18x16x128xf32> to vector<16x16x128xf32>
    %58 = vector.extract_strided_slice %9 {offsets = [2, 2, 0], sizes = [1, 1, 128], strides = [1, 1, 1]} : vector<3x3x128xf32> to vector<1x1x128xf32>
    %59 = vector.broadcast %58 : vector<1x1x128xf32> to vector<16x16x128xf32>
    %60 = arith.mulf %57, %59 : vector<16x16x128xf32>
    %61 = arith.addf %56, %60 : vector<16x16x128xf32>
    %c0_32 = arith.constant 0 : index
    %c0_33 = arith.constant 0 : index
    %c0_34 = arith.constant 0 : index
    %c0_35 = arith.constant 0 : index
    %62 = vector.load %arg5[%c0_32, %c0_33, %c0_34, %c0_35] : memref<1x16x16x128xf32, #tpu.memory_space<vmem>>, vector<1x16x16x128xf32>
    %63 = vector.shape_cast %62 : vector<1x16x16x128xf32> to vector<16x16x128xf32>
    %64 = vector.shape_cast %61 : vector<16x16x128xf32> to vector<1x16x16x128xf32>
    tpu.vector_store %arg5[%c0_32, %c0_33, %c0_34, %c0_35], %64 {strides = array<i32>} : memref<1x16x16x128xf32, #tpu.memory_space<vmem>>, vector<1x16x16x128xf32>,
    return
  }
  func.func @transform_0(%arg0: i32, %arg1: i32) -> (i32, i32, i32, i32) {
    %c0_i32 = arith.constant 0 : i32
    %c0_i32_0 = arith.constant 0 : i32
    %c0_i32_1 = arith.constant 0 : i32
    return %arg0, %c0_i32, %c0_i32_0, %arg1 : i32, i32, i32, i32
  }
  func.func @transform_1(%arg0: i32, %arg1: i32) -> (i32, i32, i32) {
    %c0_i32 = arith.constant 0 : i32
    %c0_i32_0 = arith.constant 0 : i32
    %c0_i32_1 = arith.constant 0 : i32
    return %c0_i32, %c0_i32_0, %arg1 : i32, i32, i32
  }
  func.func @transform_2(%arg0: i32, %arg1: i32) -> (i32, i32, i32) {
    %c0_i32 = arith.constant 0 : i32
    %c0_i32_0 = arith.constant 0 : i32
    %c0_i32_1 = arith.constant 0 : i32
    return %c0_i32, %c0_i32_0, %arg1 : i32, i32, i32
  }
  func.func @transform_3(%arg0: i32, %arg1: i32) -> (i32, i32, i32, i32) {
    %c0_i32 = arith.constant 0 : i32
    %c0_i32_0 = arith.constant 0 : i32
    %c0_i32_1 = arith.constant 0 : i32
    return %arg0, %c0_i32, %c0_i32_0, %arg1 : i32, i32, i32, i32
  }
}

</mosaic_0001>

<bundles_post_ra>
// kernel: dwconv3x3.1
= control target key start
LH: loop header
LB: loop body
LE: loop exit
PB: predicated region body
PF: predicated region fallthrough
CT: control target
= control target key end

     0   :  { %8 = vsyncpa [#allocation4], 0  ;;  %s2604_s0 = inlined_call_operand.hbm [shape: f32[2,16,16,128], index: 0, kind: input, shape index: {}]   ;;  %s2605_s1 = inlined_call_operand.hbm [shape: f32[3,3,128], index: 1, kind: input, shape index: {}]   ;;  %s2606_s2 = inlined_call_operand.vmem [shape: f32[1,1,128], index: 2, kind: input, shape index: {}]   ;;  %s2607_s3 = inlined_call_operand.hbm [shape: f32[2,16,16,128], index: 3, kind: output, shape index: {}]  }
   0x1   :  { %10 = vsyncpa [#allocation4 + $0x1], 0 }
   0x2   :  { %11 = vsyncpa [#allocation7], 0 }
   0x3   :  { %12 = vsyncpa [#allocation5], 0 }
   0x4   :  { %14 = vsyncpa [#allocation5 + $0x1], 0  ;;  %s1514_s12 = smov 0   ;;  %s1516_s13 = smov 0  }
   0x5   :  { %s1518_s14 = smov 0   ;;  %s1520_s15 = smov 0  }
   0x6   :  { %s1522_s16 = smov 0   ;;  %s1524_s17 = smov 0  }
   0x7 LB: > { %s1233_s18 = sadd.s32 4294967295, %s1482_s17   ;;  %s1234_s19 = sadd.s32 4294967294, %s1482_s17   ;;  %s1482_s17 = sphi %s1524_s17, %s20_s17   ;;  %s1478_s16 = sphi %s1522_s16, %s2643_s16   ;;  %s1474_s15 = sphi %s1520_s15, %s2642_s15   ;;  %s1470_s14 = sphi %s1518_s14, %s2641_s14   ;;  %s1466_s13 = sphi %s1516_s13, %s2640_s13   ;;  %s1462_s12 = sphi %s1514_s12, %s2639_s12  }
   0x8   : > { %p54_p0 = scmp.ne.s32.totalorder %s1466_s13, %s1462_s12  ;;  %p1548_p1 = scmp.eq.s32.totalorder %s1233_s18, 0 }
   0x9   : > { %p1552_p2 = scmp.eq.s32.totalorder %s1233_s18, 1  ;;  %p138_p3 = scmp.eq.s32.totalorder %s1234_s19, 1 }
   0xa   : > { %s2618_s20 = scalar_select %p1548_p1, 1, 0 }
   0xb   : > { %s2619_s21 = scalar_select %p1552_p2, 1, 0 }
   0xc   : > { %p1558_p4 = por %p1548_p1, %p54_p0  ;;  %p1235_p5 = scmp.ge.s32.totalorder %s1482_s17, 1 }
   0xd   : > { %p1563_p6 = por %p138_p3, %p54_p0  ;;  %p145_p7 = scmp.lt.s32.totalorder %s1482_s17, 3 }
   0xe   : > { %s2620_s22 = scalar_select %p1558_p4, 1, 0 }
   0xf   : > { %s2621_s23 = scalar_select %p1563_p6, 1, 0 }
  0x10   : > { %p1568_p8 = pnand %p1235_p5, %p145_p7  ;;  %s1484_s25 = smov [#allocation6]  }
  0x11   : > { %s159_s26 = sshll.u32 %s1484_s25, 4  ;;  %s32_s28 = sadd.s32 1, %s1478_s16  ;;  %s160_s26 = int_to_ptr.vmem [resolvable:$true] %s159_s26 }
  0x12   : > { %s2622_s24 = scalar_select %p1568_p8, 1, 0 }
  0x13   : > { %p1262_p9 = pneg %p1568_p8  ;;  %s1338_s4 = scalar_lea.hbm %s2605_s1, 192 }
  0x14   : > { %p1339_p12 = scmp.ne.s32.totalorder %s2605_s1, %s1338_s4  ;;  %p1345_p5 = scmp.lt.u32.totalorder %s1338_s4, %s2605_s1 }
  0x15   : > { %p1577_p11 = pnand %p1262_p9, %p1548_p1 }
  0x17   : > { %p1340_p13 = pneg %p1577_p11 }
  0x19   : > { %p1341_p0 = pnand %p1340_p13, %p1339_p12 }
  0x1b   : > { %p1342_p3 = pneg %p1341_p0 }
  0x1d   : > { %p1347_p7 = pnand %p1345_p5, %p1342_p3 }
  0x1f   : > { %1350 = shalt.err (!%p1347_p7)
}
  0x20   : > { %s1351_s9 = scalar_lea.vmem %s160_s26, 192  ;;  %p1359_p1 = scmp.lt.s32.totalorder %s160_s26, %s160_s26 }
  0x21   : > { %p1352_p9 = scmp.ne.s32.totalorder %s160_s26, %s1351_s9  ;;  %p1360_p4 = scmp.lt.s32.totalorder %s1351_s9, %s1351_s9 }
  0x23   : > { %p1354_p10 = pnand %p1352_p9, %p1340_p13  ;;  %p1361_p8 = por %p1360_p4, %p1359_p1 }
  0x25   : > { %p1355_p6 = pneg %p1354_p10 }
  0x27   : > { %p1362_p2 = pnand %p1361_p8, %p1355_p6 }
  0x29   : > { %1365 = shalt.err (!%p1362_p2)
}
  0x2a   : > { %s1485_s10 = smov 64   ;;  %s1486_s11 = smov 4  }
  0x2b   : > { %1265 = dma.hbm_to_vmem [thread:$0]  (!%p1577_p11), %s2605_s1, 192, %s160_s26, [#allocation7], %s1485_s10, %s1485_s10, %s1486_s11  }
  0x2c   : > { %p34_p1 = scmp.ge.s32.totalorder %s32_s28, 2  ;;  %s41_s25 = sadd.s32 1, %s1470_s14 }
  0x2d   : > { %p48_p2 = scmp.ne.s32.totalorder %s1470_s14, %s1466_s13  ;;  %p49_p4 = scmp.eq.s32.totalorder %s1482_s17, 0 }
  0x2e   : > { %s2645_s28 = smov (%p34_p1, %s32_s28), 0  ;;  %p2625_p8 = scmp.ne.s32.totalorder %s2619_s21, 0 }
  0x2f   : > { %p1604_p6 = por %p49_p4, %p48_p2  ;;  %s36_s27 = ssub.s32 %s1478_s16, %s2645_s28 }
  0x30   : > { %p1610_p10 = por %p2625_p8, %p48_p2  ;;  %p1275_p12 = scmp.lt.s32.totalorder %s1482_s17, 2 }
  0x31   : > { %p39_p11 = scmp.eq.s32.totalorder %s36_s27, 0  ;;  %s179_s26 = sand.u32 1, %s1470_s14  }
  0x32   : > { %s1239_s4 = sshll.u32 %s179_s26, 8  ;;  %s1252_s6 = sshll.u32 %s1478_s16, 12 }
  0x33   : > { %s1619_s5 = scalar_select %p39_p11, %s1470_s14, %s41_s25  }
  0x34   : > { %s1625_s9 = scalar_lea.hbm %s2604_s0, %s1252_s6  ;;  %s183_s21 = scalar_lea.vmem [#allocation3], %s1239_s4 }
  0x35   : > { %s191_s10 = sshll.u32 %s183_s21, 4  ;;  %p1631_p13 = pnand %p1275_p12, %p1604_p6  ;;  %s1627_s10 = int_to_ptr.vmem [resolvable:$true] %s191_s10 }
  0x36   : > { %s1635_s18 = scalar_lea.sflag [#allocation4], %s179_s26  ;;  %s1366_s19 = scalar_lea.hbm %s1625_s9, 4096 }
  0x37   : > { %p1367_p0 = scmp.ne.s32.totalorder %s1625_s9, %s1366_s19  ;;  %p1368_p3 = pneg %p1631_p13 }
  0x38   : > { %s1371_s29 = scalar_lea.hbm %s2604_s0, 8192  ;;  %p1372_p9 = scmp.lt.u32.totalorder %s1625_s9, %s2604_s0 }
  0x39   : > { %p1369_p5 = pnand %p1368_p3, %p1367_p0  ;;  %p1373_p1 = scmp.lt.u32.totalorder %s1371_s29, %s1366_s19 }
  0x3a   : > { %p1375_p4 = scmp.lt.u32.totalorder %s1366_s19, %s1625_s9 }
  0x3b   : > { %p1370_p7 = pneg %p1369_p5  ;;  %p1374_p2 = por %p1373_p1, %p1372_p9 }
  0x3d   : > { %p1376_p6 = por %p1375_p4, %p1374_p2 }
  0x3f   : > { %p1377_p8 = pnand %p1376_p6, %p1370_p7 }
  0x41   : > { %1380 = shalt.err (!%p1377_p8)
}
  0x42   : > { %s1381_s26 = scalar_lea.vmem %s1627_s10, 4096  ;;  %s1487_s7 = smov [#allocation3]  }
  0x43   : > { %p1382_p12 = scmp.ne.s32.totalorder %s1627_s10, %s1381_s26  ;;  %s1386_s8 = sshll.u32 %s1487_s7, 4  ;;  %s1387_s8 = int_to_ptr.vmem [resolvable:$false] %s1386_s8 }
  0x44   : > { %s1388_s21 = scalar_lea.vmem %s1387_s8, 8192  ;;  %p1389_p5 = scmp.lt.s32.totalorder %s1627_s10, %s1387_s8 }
  0x45   : > { %p1384_p11 = pnand %p1382_p12, %p1368_p3  ;;  %p1390_p9 = scmp.lt.s32.totalorder %s1388_s21, %s1381_s26 }
  0x47   : > { %p1385_p0 = pneg %p1384_p11  ;;  %p1391_p1 = por %p1390_p9, %p1389_p5 }
  0x49   : > { %p1392_p2 = pnand %p1391_p1, %p1385_p0 }
  0x4b   : > { %1395 = shalt.err (!%p1392_p2)
}
  0x4c   : > { %s1488_s19 = smov 128   ;;  %s1489_s25 = smov 8  }
  0x4d   : > { %1269 = dma.hbm_to_vmem [thread:$0]  (!%p1631_p13), %s1625_s9, 4096, %s1627_s10, %s1635_s18, %s1488_s19, %s1488_s19, %s1489_s25  }
  0x4e   : > { %p2628_p3 = scmp.ne.s32.totalorder %s2622_s24, 0 }
  0x50   : > { %203 = sbr.rel (%p2628_p3) target bundleno = 292 (0x124), region = 32 }
  0x57   : > { %s1666_s27 = sand.u32 1, %s1466_s13   ;;  %p2629_p7 = scmp.ne.s32.totalorder %s2620_s22, 0 }
  0x58   : > { %s1243_s29 = sshll.u32 %s1666_s27, 8  ;;  %s206_s4 = scalar_lea.sflag [#allocation4], %s1666_s27 }
  0x59   : > { %s1672_s6 = scalar_lea.vmem [#allocation3], %s1243_s29 }
  0x5a   : > { %1449 = dma.done.wait (%p2629_p7), %s206_s4, 4096  }
  0x5b   : > { %1451 = vsyncadd (%p2629_p7), %s206_s4, 4294963200  ;;  %p2630_p13 = scmp.ne.s32.totalorder %s2618_s20, 0 }
  0x5d   : > { %1453 = dma.done.wait (%p2630_p13), [#allocation7], 192  }
  0x5e   : > { %1455 = vsyncadd (%p2630_p13), [#allocation7], 4294967104  ;;  %v1490_v0 = vmov 0.0   ;;  %v393_v1 = vlaneseq  ;;  %v1683_v2 = vld [vmem:[%s1672_s6] sm:$0xff]  ;;  %v1686_v3 = vld [vmem:[%s1672_s6 + $0x8] sm:$0xff]  ;;  %s1897_s24 = scalar_lea.vmem [#allocation8], %s1243_s29 }
  0x5f   : > { %242 = vst [vmem:[#allocation2] sm:$0xff] %v1490_v0  ;;  %243 = vst [vmem:[#allocation2 + $0x8] sm:$0xff] %v1490_v0  ;;  %v1689_v4 = vld [vmem:[%s1672_s6 + $0x10] sm:$0xff]  ;;  %v1695_v5 = vld [vmem:[%s1672_s6 + $0x18] sm:$0xff]  ;;  %s1253_s11 = sshll.u32 %s1474_s15, 12  ;;  %s1124_s18 = sshll.u32 %s1897_s24, 4  ;;  %s2554_s18 = int_to_ptr.vmem [resolvable:$true] %s1124_s18 }
  0x60   : > { %244 = vst [vmem:[#allocation2 + $0x10] sm:$0x3] %v1490_v0  ;;  %246 = vst [vmem:[#allocation2 + $0x198] sm:$0xff] %v1490_v0  ;;  %v1698_v6 = vld [vmem:[%s1672_s6 + $0x20] sm:$0xff]  ;;  %v1701_v7 = vld [vmem:[%s1672_s6 + $0x28] sm:$0xff]  ;;  %v394_v14 = vshrl.u32 %v393_v1, 7  ;;  %s2552_s8 = scalar_lea.hbm %s2607_s3, %s1253_s11 }
  0x61   : > { %247 = vst [vmem:[#allocation2 + $0x1a0] sm:$0xff] %v1490_v0  ;;  %248 = vst [vmem:[#allocation2 + $0x1a8] sm:$0x3] %v1490_v0  ;;  %v1707_v8 = vld [vmem:[%s1672_s6 + $0x30] sm:$0xff]  ;;  %v1710_v9 = vld [vmem:[%s1672_s6 + $0x38] sm:$0xff]  ;;  %s1110_s21 = scalar_lea.sflag [#allocation5], %s1666_s27 }
  0x62   : > { %250 = vst [vmem:[#allocation2 + $0x18] sm:$0x1] %v1490_v0  ;;  %251 = vst [vmem:[#allocation2 + $0x30] sm:$0x1] %v1490_v0  ;;  %v1713_v10 = vld [vmem:[%s1672_s6 + $0x40] sm:$0xff]  ;;  %v1719_v11 = vld [vmem:[%s1672_s6 + $0x48] sm:$0xff] }
  0x63   : > { %252 = vst [vmem:[#allocation2 + $0x48] sm:$0x1] %v1490_v0  ;;  %253 = vst [vmem:[#allocation2 + $0x60] sm:$0x1] %v1490_v0  ;;  %v1722_v12 = vld [vmem:[%s1672_s6 + $0x50] sm:$0xff]  ;;  %v1725_v13 = vld [vmem:[%s1672_s6 + $0x58] sm:$0xff] }
  0x64   : > { %254 = vst [vmem:[#allocation2 + $0x78] sm:$0x1] %v1490_v0  ;;  %255 = vst [vmem:[#allocation2 + $0x90] sm:$0x1] %v1490_v0  ;;  %v1731_v15 = vld [vmem:[%s1672_s6 + $0x60] sm:$0xff]  ;;  %v1734_v16 = vld [vmem:[%s1672_s6 + $0x68] sm:$0xff] }
  0x65   : > { %256 = vst [vmem:[#allocation2 + $0xa8] sm:$0x1] %v1490_v0  ;;  %257 = vst [vmem:[#allocation2 + $0xc0] sm:$0x1] %v1490_v0  ;;  %v1737_v17 = vld [vmem:[%s1672_s6 + $0x70] sm:$0xff]  ;;  %v1743_v18 = vld [vmem:[%s1672_s6 + $0x78] sm:$0xff] }
  0x66   : > { %258 = vst [vmem:[#allocation2 + $0xd8] sm:$0x1] %v1490_v0  ;;  %259 = vst [vmem:[#allocation2 + $0xf0] sm:$0x1] %v1490_v0  ;;  %v1746_v19 = vld [vmem:[%s1672_s6 + $0x80] sm:$0xff]  ;;  %v1749_v20 = vld [vmem:[%s1672_s6 + $0x88] sm:$0xff] }
  0x67   : > { %260 = vst [vmem:[#allocation2 + $0x108] sm:$0x1] %v1490_v0  ;;  %261 = vst [vmem:[#allocation2 + $0x120] sm:$0x1] %v1490_v0  ;;  %v1755_v21 = vld [vmem:[%s1672_s6 + $0x90] sm:$0xff]  ;;  %v1758_v22 = vld [vmem:[%s1672_s6 + $0x98] sm:$0xff] }
  0x68   : > { %262 = vst [vmem:[#allocation2 + $0x138] sm:$0x1] %v1490_v0  ;;  %263 = vst [vmem:[#allocation2 + $0x150] sm:$0x1] %v1490_v0  ;;  %v1761_v23 = vld [vmem:[%s1672_s6 + $0xa0] sm:$0xff]  ;;  %v1767_v24 = vld [vmem:[%s1672_s6 + $0xa8] sm:$0xff] }
  0x69   : > { %264 = vst [vmem:[#allocation2 + $0x168] sm:$0x1] %v1490_v0  ;;  %265 = vst [vmem:[#allocation2 + $0x180] sm:$0x1] %v1490_v0  ;;  %v1770_v25 = vld [vmem:[%s1672_s6 + $0xb0] sm:$0xff]  ;;  %v305_v26 = vld [vmem:[%s1672_s6 + $0xb8] sm:$0xff] }
  0x6a   : > { %266 = vst [vmem:[#allocation2 + $0x29] sm:$0x1] %v1490_v0  ;;  %267 = vst [vmem:[#allocation2 + $0x41] sm:$0x1] %v1490_v0  ;;  %v395_v27 = vsub.s32 0, %v394_v14  ;;  %v306_v28 = vld [vmem:[%s1672_s6 + $0xc0] sm:$0xff] }
  0x6b   : > { %268 = vst [vmem:[#allocation2 + $0x59] sm:$0x1] %v1490_v0  ;;  %269 = vst [vmem:[#allocation2 + $0x71] sm:$0x1] %v1490_v0  ;;  %v307_v29 = vld [vmem:[%s1672_s6 + $0xc8] sm:$0xff]  ;;  %v308_v30 = vld [vmem:[%s1672_s6 + $0xd0] sm:$0xff] }
  0x6c   : > { %270 = vst [vmem:[#allocation2 + $0x89] sm:$0x1] %v1490_v0  ;;  %271 = vst [vmem:[#allocation2 + $0xa1] sm:$0x1] %v1490_v0  ;;  %v309_v31 = vld [vmem:[%s1672_s6 + $0xd8] sm:$0xff]  ;;  %v310_v32 = vld [vmem:[%s1672_s6 + $0xe0] sm:$0xff] }
  0x6d   : > { %272 = vst [vmem:[#allocation2 + $0xb9] sm:$0x1] %v1490_v0  ;;  %273 = vst [vmem:[#allocation2 + $0xd1] sm:$0x1] %v1490_v0  ;;  %v311_v33 = vld [vmem:[%s1672_s6 + $0xe8] sm:$0xff]  ;;  %v312_v34 = vld [vmem:[%s1672_s6 + $0xf0] sm:$0xff] }
  0x6e   : > { %274 = vst [vmem:[#allocation2 + $0xe9] sm:$0x1] %v1490_v0  ;;  %275 = vst [vmem:[#allocation2 + $0x101] sm:$0x1] %v1490_v0  ;;  %v313_v35 = vld [vmem:[%s1672_s6 + $0xf8] sm:$0xff]  ;;  %v635_v37 = vsub.s32 1, %v394_v14 }
  0x6f   : > { %276 = vst [vmem:[#allocation2 + $0x119] sm:$0x1] %v1490_v0  ;;  %277 = vst [vmem:[#allocation2 + $0x131] sm:$0x1] %v1490_v0  ;;  %v346_v36 = vld [vmem:[#allocation6] sm:$0x7] }
  0x70   : > { %278 = vst [vmem:[#allocation2 + $0x149] sm:$0x1] %v1490_v0  ;;  %279 = vst [vmem:[#allocation2 + $0x161] sm:$0x1] %v1490_v0  ;;  %v875_v38 = vsub.s32 2, %v394_v14  ;;  %v1783_v41 = vrot.slane %v346_v36, %v395_v27  ;;  %v597_v48 = vld [vmem:[#allocation2 + $0x1] sm:$0xff]  ;;  %v1798_v50 = vrot.slane %v346_v36, %v635_v37 }
  0x71   : > { %280 = vst [vmem:[#allocation2 + $0x179] sm:$0x1] %v1490_v0  ;;  %281 = vst [vmem:[#allocation2 + $0x191] sm:$0x1] %v1490_v0  ;;  %v347_v39 = vld [vmem:[#allocation6 + $0x4] sm:$0x7] }
  0x72   : > { %314 = vst [vmem:[#allocation2 + $0x19] sm:$0xff] %v1683_v2  ;;  %315 = vst [vmem:[#allocation2 + $0x21] sm:$0xff] %v1686_v3  ;;  %v348_v40 = vld [vmem:[#allocation6 + $0x8] sm:$0x7]  ;;  %v1788_v42 = vld [vmem:[%s2606_s2] ss:$0 sm:$0xff]  ;;  %v1790_v44 = vrot.slane %v347_v39, %v395_v27  ;;  %v1800_v51 = vrot.slane %v347_v39, %v635_v37  ;;  %v1802_v53 = vrot.slane %v346_v36, %v875_v38 }
  0x73   : > { %316 = vst [vmem:[#allocation2 + $0x31] sm:$0xff] %v1689_v4  ;;  %317 = vst [vmem:[#allocation2 + $0x39] sm:$0xff] %v1695_v5  ;;  %v1792_v45 = vrot.slane %v348_v40, %v395_v27  ;;  %v397_v47 = vmul.f32 0.0, %v1783_v41  ;;  %v837_v52 = vld [vmem:[#allocation2 + $0x2] sm:$0xff]  ;;  %v1805_v56 = vrot.slane %v348_v40, %v635_v37  ;;  %v1807_v57 = vrot.slane %v347_v39, %v875_v38  ;;  %s1396_s19 = scalar_lea.vmem %s2554_s18, 4096  ;;  %s1491_s15 = smov [#allocation8]  }
  0x74   : > { %318 = vst [vmem:[#allocation2 + $0x49] sm:$0xff] %v1698_v6  ;;  %319 = vst [vmem:[#allocation2 + $0x51] sm:$0xff] %v1701_v7  ;;  %v1809_v58 = vrot.slane %v348_v40, %v875_v38  ;;  %v598_v60 = vld [vmem:[#allocation2 + $0x9] sm:$0xff]  ;;  %v637_v62 = vmul.f32 %v1798_v50, %v597_v48  ;;  %v706_v38 = vmul.f32 %v1800_v51, %v1686_v3  ;;  %p1397_p4 = scmp.ne.s32.totalorder %s2554_s18, %s1396_s19  ;;  %s1400_s25 = sshll.u32 %s1491_s15, 4  ;;  %s1401_s25 = int_to_ptr.vmem [resolvable:$false] %s1400_s25 }
  0x75   : > { %320 = vst [vmem:[#allocation2 + $0x61] sm:$0xff] %v1707_v8  ;;  %321 = vst [vmem:[#allocation2 + $0x69] sm:$0xff] %v1710_v9  ;;  %v429_v55 = vadd.f32 %v1788_v42, %v397_v47  ;;  %v773_v27 = vmul.f32 %v1805_v56, %v1689_v4  ;;  %v774_v47 = vmul.f32 %v1805_v56, %v1695_v5  ;;  %s1402_s29 = scalar_lea.vmem %s1401_s25, 8192  ;;  %p1403_p12 = scmp.lt.s32.totalorder %s2554_s18, %s1401_s25 }
  0x76   : > { %322 = vst [vmem:[#allocation2 + $0x79] sm:$0xff] %v1713_v10  ;;  %323 = vst [vmem:[#allocation2 + $0x81] sm:$0xff] %v1719_v11  ;;  %p1398_p6 = pnand %p1397_p4, %p1610_p10  ;;  %p1404_p11 = scmp.lt.s32.totalorder %s1402_s29, %s1396_s19 }
  0x77   : > { %324 = vst [vmem:[#allocation2 + $0x91] sm:$0xff] %v1722_v12  ;;  %325 = vst [vmem:[#allocation2 + $0x99] sm:$0xff] %v1725_v13 }
  0x78   : > { %326 = vst [vmem:[#allocation2 + $0xa9] sm:$0xff] %v1731_v15  ;;  %327 = vst [vmem:[#allocation2 + $0xb1] sm:$0xff] %v1734_v16  ;;  %p1399_p8 = pneg %p1398_p6  ;;  %p1405_p0 = por %p1404_p11, %p1403_p12 }
  0x79   : > { %328 = vst [vmem:[#allocation2 + $0xc1] sm:$0xff] %v1737_v17  ;;  %329 = vst [vmem:[#allocation2 + $0xc9] sm:$0xff] %v1743_v18  ;;  %v359_v43 = vld [vmem:[#allocation2 + $0x18] sm:$0xff]  ;;  %v360_v54 = vld [vmem:[#allocation2 + $0x20] sm:$0xff] }
  0x7a   : > { %330 = vst [vmem:[#allocation2 + $0xd9] sm:$0xff] %v1746_v19  ;;  %331 = vst [vmem:[#allocation2 + $0xe1] sm:$0xff] %v1749_v20  ;;  %v1794_v46 = vld [vmem:[#allocation2 + $0x30] sm:$0xff]  ;;  %v465_v49 = vmul.f32 %v1790_v44, %v359_v43  ;;  %v1811_v59 = vld [vmem:[#allocation2 + $0x38] sm:$0xff]  ;;  %v466_v1 = vmul.f32 %v1790_v44, %v360_v54  ;;  %p1406_p5 = pnand %p1405_p0, %p1399_p8 }
  0x7b   : > { %2631 = vst [vmem:[#allocation12_spill] sm:$0xff] %v1761_v23  ;;  %332 = vst [vmem:[#allocation2 + $0xf1] sm:$0xff] %v1755_v21  ;;  %v533_v61 = vmul.f32 %v1792_v45, %v1794_v46  ;;  %v839_v63 = vld [vmem:[#allocation2 + $0x1a] sm:$0xff]  ;;  %v1816_v0 = vld [vmem:[#allocation2 + $0x32] sm:$0xff] }
  0x7c   : > { %333 = vst [vmem:[#allocation2 + $0xf9] sm:$0xff] %v1758_v22  ;;  %334 = vst [vmem:[#allocation2 + $0x109] sm:$0xff] %v1761_v23  ;;  %v497_v14 = vadd.f32 %v465_v49, %v429_v55  ;;  %v945_v36 = vmul.f32 %v1807_v57, %v839_v63  ;;  %v1013_v37 = vmul.f32 %v1809_v58, %v1816_v0  ;;  %v1835_v39 = vld [vmem:[#allocation2 + $0x48] sm:$0xff]  ;;  %v1839_v48 = vld [vmem:[#allocation2 + $0x3a] sm:$0xff] }
  0x7d   : > { %2632 = vst [vmem:[#allocation13_spill] sm:$0xff] %v1767_v24  ;;  %2633 = vst [vmem:[#allocation14_spill] sm:$0xff] %v1770_v25  ;;  %v879_v23 = vmul.f32 %v1802_v53, %v839_v63  ;;  %v469_v63 = vmul.f32 %v1790_v44, %v1835_v39 }
  0x7e   : > { %335 = vst [vmem:[#allocation2 + $0x111] sm:$0xff] %v1767_v24  ;;  %336 = vst [vmem:[#allocation2 + $0x121] sm:$0xff] %v1770_v25 }
  0x7f   : > { %337 = vst [vmem:[#allocation2 + $0x129] sm:$0xff] %v305_v26  ;;  %338 = vst [vmem:[#allocation2 + $0x139] sm:$0xff] %v306_v28  ;;  %v705_v26 = vmul.f32 %v1800_v51, %v1683_v2  ;;  %v877_v28 = vmul.f32 %v1802_v53, %v837_v52 }
  0x80   : > { %339 = vst [vmem:[#allocation2 + $0x141] sm:$0xff] %v307_v29  ;;  %340 = vst [vmem:[#allocation2 + $0x151] sm:$0xff] %v308_v30  ;;  %v498_v29 = vadd.f32 %v466_v1, %v429_v55  ;;  %v534_v30 = vmul.f32 %v1792_v45, %v1811_v59 }
  0x81   : > { %341 = vst [vmem:[#allocation2 + $0x159] sm:$0xff] %v309_v31  ;;  %342 = vst [vmem:[#allocation2 + $0x169] sm:$0xff] %v310_v32  ;;  %v638_v31 = vmul.f32 %v1798_v50, %v598_v60  ;;  %v838_v32 = vld [vmem:[#allocation2 + $0xa] sm:$0xff] }
  0x82   : > { %343 = vst [vmem:[#allocation2 + $0x171] sm:$0xff] %v311_v33  ;;  %344 = vst [vmem:[#allocation2 + $0x181] sm:$0xff] %v312_v34  ;;  %v1827_v33 = vld [vmem:[#allocation2 + $0x22] sm:$0xff]  ;;  %v399_v34 = vmul.f32 %v1783_v41, %v359_v43  ;;  %v566_v40 = vadd.f32 %v534_v30, %v498_v29  ;;  %v467_v43 = vmul.f32 %v1790_v44, %v1794_v46 }
  0x83   : > { %345 = vst [vmem:[#allocation2 + $0x189] sm:$0xff] %v313_v35  ;;  %v565_v35 = vadd.f32 %v533_v61, %v497_v14  ;;  %v878_v55 = vmul.f32 %v1802_v53, %v838_v32  ;;  %v946_v60 = vmul.f32 %v1807_v57, %v1827_v33  ;;  %v400_v61 = vmul.f32 %v1783_v41, %v360_v54 }
  0x84   : > { %v431_v49 = vadd.f32 %v1788_v42, %v399_v34  ;;  %v670_v1 = vadd.f32 %v638_v31, %v566_v40  ;;  %v535_v29 = vmul.f32 %v1792_v45, %v1835_v39  ;;  %v639_v30 = vmul.f32 %v1798_v50, %v1683_v2  ;;  %v1852_v34 = vld [vmem:[#allocation2 + $0x50] sm:$0xff] }
  0x85   : > { %v669_v52 = vadd.f32 %v637_v62, %v565_v35  ;;  %v1014_v62 = vmul.f32 %v1809_v58, %v1839_v48  ;;  %v432_v32 = vadd.f32 %v1788_v42, %v400_v61  ;;  %v468_v35 = vmul.f32 %v1790_v44, %v1811_v59 }
  0x86   : > { %v499_v14 = vadd.f32 %v467_v43, %v431_v49  ;;  %v738_v54 = vadd.f32 %v706_v38, %v670_v1  ;;  %v707_v40 = vmul.f32 %v1800_v51, %v1689_v4  ;;  %v775_v49 = vmul.f32 %v1805_v56, %v1698_v6  ;;  %v1868_v38 = vld [vmem:[#allocation2 + $0x60] sm:$0xff] }
  0x87   : > { %v737_v25 = vadd.f32 %v705_v26, %v669_v52  ;;  %v500_v43 = vadd.f32 %v468_v35, %v432_v32  ;;  %v536_v26 = vmul.f32 %v1792_v45, %v1852_v34  ;;  %v640_v52 = vmul.f32 %v1798_v50, %v1686_v3  ;;  %v1876_v3 = vld [vmem:[#allocation2 + $0x4a] sm:$0xff] }
  0x88   : > { %v567_v31 = vadd.f32 %v535_v29, %v499_v14  ;;  %v806_v61 = vadd.f32 %v774_v47, %v738_v54  ;;  %v401_v1 = vmul.f32 %v1783_v41, %v1794_v46  ;;  %v708_v29 = vmul.f32 %v1800_v51, %v1695_v5 }
  0x89   : > { %v805_v2 = vadd.f32 %v773_v27, %v737_v25  ;;  %v947_v25 = vmul.f32 %v1807_v57, %v1816_v0  ;;  %v568_v27 = vadd.f32 %v536_v26, %v500_v43  ;;  %v776_v46 = vmul.f32 %v1805_v56, %v1701_v7 }
  0x8a   : > { %v671_v24 = vadd.f32 %v639_v30, %v567_v31  ;;  %v910_v32 = vadd.f32 %v878_v55, %v806_v61  ;;  %v433_v47 = vadd.f32 %v1788_v42, %v401_v1  ;;  %v1015_v43 = vmul.f32 %v1809_v58, %v1876_v3 }
  0x8b   : > { %v909_v14 = vadd.f32 %v877_v28, %v805_v2  ;;  %v672_v54 = vadd.f32 %v640_v52, %v568_v27  ;;  %v537_v28 = vmul.f32 %v1792_v45, %v1868_v38  ;;  %v948_v27 = vmul.f32 %v1807_v57, %v1839_v48 }
  0x8c   : > { %v739_v35 = vadd.f32 %v707_v40, %v671_v24  ;;  %v978_v31 = vadd.f32 %v946_v60, %v910_v32  ;;  %v501_v55 = vadd.f32 %v469_v63, %v433_v47  ;;  %v641_v24 = vmul.f32 %v1798_v50, %v1689_v4  ;;  %v1893_v60 = vld [vmem:[#allocation2 + $0x68] sm:$0xff] }
  0x8d   : > { %v977_v30 = vadd.f32 %v945_v36, %v909_v14  ;;  %v740_v26 = vadd.f32 %v708_v29, %v672_v54  ;;  %v402_v36 = vmul.f32 %v1783_v41, %v1811_v59  ;;  %v709_v14 = vmul.f32 %v1800_v51, %v1698_v6 }
  0x8e   : > { %v807_v2 = vadd.f32 %v775_v49, %v739_v35  ;;  %v1046_v52 = vadd.f32 %v1014_v62, %v978_v31  ;;  %v569_v1 = vadd.f32 %v537_v28, %v501_v55  ;;  %v1906_v49 = vld [vmem:[#allocation2 + $0x52] sm:$0xff]  ;;  %v777_v32 = vmul.f32 %v1805_v56, %v1707_v8 }
  0x8f   : > { %v1045_v40 = vadd.f32 %v1013_v37, %v977_v30  ;;  %v808_v4 = vadd.f32 %v776_v46, %v740_v26  ;;  %v880_v37 = vmul.f32 %v1802_v53, %v1827_v33  ;;  %v434_v59 = vadd.f32 %v1788_v42, %v402_v36  ;;  %v1922_v55 = vld [vmem:[#allocation2 + $0x78] sm:$0xff] }
  0x90   : > { %v911_v61 = vadd.f32 %v879_v23, %v807_v2  ;;  %v470_v23 = vmul.f32 %v1790_v44, %v1852_v34  ;;  %1078 = vst [vmem:[%s1897_s24 + $0x8] sm:$0xff] %v1046_v52  ;;  %v673_v29 = vadd.f32 %v641_v24, %v569_v1  ;;  %v538_v33 = vmul.f32 %v1792_v45, %v1893_v60 }
  0x91   : > { %1077 = vst [vmem:[%s1897_s24] sm:$0xff] %v1045_v40  ;;  %v912_v35 = vadd.f32 %v880_v37, %v808_v4  ;;  %v642_v63 = vmul.f32 %v1798_v50, %v1695_v5  ;;  %v403_v54 = vmul.f32 %v1783_v41, %v1835_v39  ;;  %v1016_v28 = vmul.f32 %v1809_v58, %v1906_v49  ;;  %v1925_v40 = vld [vmem:[#allocation2 + $0x62] sm:$0xff] }
  0x92   : > { %v979_v62 = vadd.f32 %v947_v25, %v911_v61  ;;  %v502_v47 = vadd.f32 %v470_v23, %v434_v59  ;;  %v741_v25 = vadd.f32 %v709_v14, %v673_v29  ;;  %v710_v2 = vmul.f32 %v1800_v51, %v1701_v7  ;;  %v1943_v23 = vld [vmem:[#allocation2 + $0x80] sm:$0xff] }
  0x93   : > { %v980_v46 = vadd.f32 %v948_v27, %v912_v35  ;;  %v881_v5 = vmul.f32 %v1802_v53, %v1816_v0  ;;  %v435_v39 = vadd.f32 %v1788_v42, %v403_v54  ;;  %v949_v36 = vmul.f32 %v1807_v57, %v1876_v3 }
  0x94   : > { %v1047_v30 = vadd.f32 %v1015_v43, %v979_v62  ;;  %v570_v31 = vadd.f32 %v538_v33, %v502_v47  ;;  %v809_v24 = vadd.f32 %v777_v32, %v741_v25  ;;  %v471_v43 = vmul.f32 %v1790_v44, %v1868_v38  ;;  %v1951_v47 = vld [vmem:[#allocation2 + $0x6a] sm:$0xff] }
  0x95   : > { %v1048_v26 = vadd.f32 %v1016_v28, %v980_v46  ;;  %v778_v61 = vmul.f32 %v1805_v56, %v1710_v9  ;;  %v539_v4 = vmul.f32 %v1792_v45, %v1922_v55  ;;  %v643_v0 = vmul.f32 %v1798_v50, %v1698_v6 }
  0x96   : > { %1079 = vst [vmem:[%s1897_s24 + $0x10] sm:$0xff] %v1047_v30  ;;  %v674_v52 = vadd.f32 %v642_v63, %v570_v31  ;;  %v913_v1 = vadd.f32 %v881_v5, %v809_v24  ;;  %v503_v14 = vadd.f32 %v471_v43, %v435_v39  ;;  %v1017_v37 = vmul.f32 %v1809_v58, %v1925_v40 }
  0x97   : > { %1080 = vst [vmem:[%s1897_s24 + $0x18] sm:$0xff] %v1048_v26  ;;  %v404_v62 = vmul.f32 %v1783_v41, %v1852_v34  ;;  %v882_v29 = vmul.f32 %v1802_v53, %v1839_v48  ;;  %v711_v35 = vmul.f32 %v1800_v51, %v1707_v8  ;;  %v950_v33 = vmul.f32 %v1807_v57, %v1906_v49 }
  0x98   : > { %v742_v59 = vadd.f32 %v710_v2, %v674_v52  ;;  %v981_v27 = vadd.f32 %v949_v36, %v913_v1  ;;  %v571_v32 = vadd.f32 %v539_v4, %v503_v14  ;;  %v472_v34 = vmul.f32 %v1790_v44, %v1893_v60  ;;  %v1964_v2 = vld [vmem:[#allocation2 + $0x90] sm:$0xff]  ;;  %v1975_v52 = vld [vmem:[#allocation2 + $0x7a] sm:$0xff] }
  0x99   : > { %v436_v63 = vadd.f32 %v1788_v42, %v404_v62  ;;  %v779_v48 = vmul.f32 %v1805_v56, %v1713_v10  ;;  %v540_v54 = vmul.f32 %v1792_v45, %v1943_v23  ;;  %v644_v31 = vmul.f32 %v1798_v50, %v1701_v7  ;;  %v1986_v62 = vld [vmem:[#allocation2 + $0x98] sm:$0xff] }
  0x9a   : > { %v810_v6 = vadd.f32 %v778_v61, %v742_v59  ;;  %v1049_v30 = vadd.f32 %v1017_v37, %v981_v27  ;;  %v675_v25 = vadd.f32 %v643_v0, %v571_v32  ;;  %v405_v24 = vmul.f32 %v1783_v41, %v1868_v38 }
  0x9b   : > { %v504_v28 = vadd.f32 %v472_v34, %v436_v63  ;;  %v1018_v5 = vmul.f32 %v1809_v58, %v1951_v47  ;;  %v883_v43 = vmul.f32 %v1802_v53, %v1876_v3  ;;  %v712_v26 = vmul.f32 %v1800_v51, %v1710_v9 }
  0x9c   : > { %v914_v46 = vadd.f32 %v882_v29, %v810_v6  ;;  %1081 = vst [vmem:[%s1897_s24 + $0x20] sm:$0xff] %v1049_v30  ;;  %v743_v39 = vadd.f32 %v711_v35, %v675_v25  ;;  %v437_v61 = vadd.f32 %v1788_v42, %v405_v24  ;;  %v473_v38 = vmul.f32 %v1790_v44, %v1922_v55 }
  0x9d   : > { %v572_v7 = vadd.f32 %v540_v54, %v504_v28  ;;  %v780_v14 = vmul.f32 %v1805_v56, %v1719_v11  ;;  %v541_v3 = vmul.f32 %v1792_v45, %v1964_v2  ;;  %v645_v4 = vmul.f32 %v1798_v50, %v1707_v8 }
  0x9e   : > { %v982_v36 = vadd.f32 %v950_v33, %v914_v46  ;;  %v811_v1 = vadd.f32 %v779_v48, %v743_v39  ;;  %v505_v59 = vadd.f32 %v473_v38, %v437_v61  ;;  %v406_v27 = vmul.f32 %v1783_v41, %v1893_v60  ;;  %v1997_v33 = vld [vmem:[#allocation2 + $0x82] sm:$0xff] }
  0x9f   : > { %v676_v37 = vadd.f32 %v644_v31, %v572_v7  ;;  %v951_v32 = vmul.f32 %v1807_v57, %v1925_v40  ;;  %v1019_v35 = vmul.f32 %v1809_v58, %v1975_v52  ;;  %v713_v6 = vmul.f32 %v1800_v51, %v1713_v10  ;;  %v2018_v38 = vld [vmem:[#allocation2 + $0xa8] sm:$0xff] }
  0xa0   : > { %v1050_v0 = vadd.f32 %v1018_v5, %v982_v36  ;;  %v915_v29 = vadd.f32 %v883_v43, %v811_v1  ;;  %v573_v63 = vadd.f32 %v541_v3, %v505_v59  ;;  %v438_v34 = vadd.f32 %v1788_v42, %v406_v27 }
  0xa1   : > { %v744_v8 = vadd.f32 %v712_v26, %v676_v37  ;;  %v474_v60 = vmul.f32 %v1790_v44, %v1943_v23  ;;  %v884_v25 = vmul.f32 %v1802_v53, %v1906_v49  ;;  %v781_v48 = vmul.f32 %v1805_v56, %v1722_v12 }
  0xa2   : > { %1082 = vst [vmem:[%s1897_s24 + $0x28] sm:$0xff] %v1050_v0  ;;  %v983_v30 = vadd.f32 %v951_v32, %v915_v29  ;;  %v542_v54 = vmul.f32 %v1792_v45, %v1986_v62  ;;  %v677_v28 = vadd.f32 %v645_v4, %v573_v63  ;;  %v646_v24 = vmul.f32 %v1798_v50, %v1710_v9  ;;  %v2021_v9 = vld [vmem:[#allocation2 + $0x92] sm:$0xff] }
  0xa3   : > { %v812_v46 = vadd.f32 %v780_v14, %v744_v8  ;;  %v506_v31 = vadd.f32 %v474_v60, %v438_v34  ;;  %v952_v39 = vmul.f32 %v1807_v57, %v1951_v47  ;;  %v1020_v49 = vmul.f32 %v1809_v58, %v1997_v33  ;;  %v2040_v34 = vld [vmem:[#allocation2 + $0xb0] sm:$0xff] }
  0xa4   : > { %v1051_v5 = vadd.f32 %v1019_v35, %v983_v30  ;;  %v407_v43 = vmul.f32 %v1783_v41, %v1922_v55  ;;  %v745_v36 = vadd.f32 %v713_v6, %v677_v28  ;;  %v714_v61 = vmul.f32 %v1800_v51, %v1719_v11 }
  0xa5   : > { %v916_v26 = vadd.f32 %v884_v25, %v812_v46  ;;  %v574_v7 = vadd.f32 %v542_v54, %v506_v31  ;;  %v885_v1 = vmul.f32 %v1802_v53, %v1925_v40  ;;  %v953_v14 = vmul.f32 %v1807_v57, %v1975_v52  ;;  %v2048_v54 = vld [vmem:[#allocation2 + $0x9a] sm:$0xff] }
  0xa6   : > { %1083 = vst [vmem:[%s1897_s24 + $0x30] sm:$0xff] %v1051_v5  ;;  %v439_v3 = vadd.f32 %v1788_v42, %v407_v43  ;;  %v475_v55 = vmul.f32 %v1790_v44, %v1964_v2  ;;  %v813_v0 = vadd.f32 %v781_v48, %v745_v36  ;;  %v782_v59 = vmul.f32 %v1805_v56, %v1725_v13  ;;  %v2060_v36 = vld [vmem:[#allocation2 + $0xc0] sm:$0xff] }
  0xa7   : > { %v984_v4 = vadd.f32 %v952_v39, %v916_v26  ;;  %v678_v37 = vadd.f32 %v646_v24, %v574_v7  ;;  %v543_v29 = vmul.f32 %v1792_v45, %v2018_v38  ;;  %v647_v40 = vmul.f32 %v1798_v50, %v1713_v10 }
  0xa8   : > { %v507_v27 = vadd.f32 %v475_v55, %v439_v3  ;;  %v408_v32 = vmul.f32 %v1783_v41, %v1943_v23  ;;  %v917_v6 = vadd.f32 %v885_v1, %v813_v0  ;;  %v1021_v8 = vmul.f32 %v1809_v58, %v2021_v9  ;;  %v2069_v3 = vld [vmem:[#allocation2 + $0xaa] sm:$0xff] }
  0xa9   : > { %v1052_v35 = vadd.f32 %v1020_v49, %v984_v4  ;;  %v746_v63 = vadd.f32 %v714_v61, %v678_v37  ;;  %v715_v30 = vmul.f32 %v1800_v51, %v1722_v12  ;;  %v476_v10 = vmul.f32 %v1790_v44, %v1986_v62 }
  0xaa   : > { %v575_v60 = vadd.f32 %v543_v29, %v507_v27  ;;  %v440_v25 = vadd.f32 %v1788_v42, %v408_v32  ;;  %v985_v48 = vadd.f32 %v953_v14, %v917_v6  ;;  %v886_v46 = vmul.f32 %v1802_v53, %v1951_v47 }
  0xab   : > { %1084 = vst [vmem:[%s1897_s24 + $0x38] sm:$0xff] %v1052_v35  ;;  %v814_v23 = vadd.f32 %v782_v59, %v746_v63  ;;  %v783_v28 = vmul.f32 %v1805_v56, %v1731_v15  ;;  %v544_v5 = vmul.f32 %v1792_v45, %v2040_v34  ;;  %v648_v39 = vmul.f32 %v1798_v50, %v1719_v11 }
  0xac   : > { %v679_v31 = vadd.f32 %v647_v40, %v575_v60  ;;  %v508_v24 = vadd.f32 %v476_v10, %v440_v25  ;;  %v1053_v49 = vadd.f32 %v1021_v8, %v985_v48  ;;  %v954_v26 = vmul.f32 %v1807_v57, %v1997_v33  ;;  %v2088_v60 = vld [vmem:[#allocation2 + $0xc8] sm:$0xff] }
  0xad   : > { %v918_v43 = vadd.f32 %v886_v46, %v814_v23  ;;  %v409_v47 = vmul.f32 %v1783_v41, %v1964_v2  ;;  %v1022_v7 = vmul.f32 %v1809_v58, %v2048_v54  ;;  %v716_v14 = vmul.f32 %v1800_v51, %v1725_v13  ;;  %v2096_v23 = vld [vmem:[#allocation2 + $0xb2] sm:$0xff] }
  0xae   : > { %v747_v61 = vadd.f32 %v715_v30, %v679_v31  ;;  %v576_v1 = vadd.f32 %v544_v5, %v508_v24  ;;  %1085 = vst [vmem:[%s1897_s24 + $0x40] sm:$0xff] %v1053_v49  ;;  %v887_v55 = vmul.f32 %v1802_v53, %v1975_v52  ;;  %v477_v2 = vmul.f32 %v1790_v44, %v2018_v38 }
  0xaf   : > { %v986_v11 = vadd.f32 %v954_v26, %v918_v43  ;;  %v441_v4 = vadd.f32 %v1788_v42, %v409_v47  ;;  %v784_v59 = vmul.f32 %v1805_v56, %v1734_v16  ;;  %v545_v27 = vmul.f32 %v1792_v45, %v2060_v36  ;;  %v2108_v47 = vld [vmem:[#allocation2 + $0xd8] sm:$0xff] }
  0xb0   : > { %v815_v0 = vadd.f32 %v783_v28, %v747_v61  ;;  %v680_v37 = vadd.f32 %v648_v39, %v576_v1  ;;  %v649_v32 = vmul.f32 %v1798_v50, %v1722_v12  ;;  %v410_v52 = vmul.f32 %v1783_v41, %v1986_v62 }
  0xb1   : > { %v1054_v29 = vadd.f32 %v1022_v7, %v986_v11  ;;  %v509_v40 = vadd.f32 %v477_v2, %v441_v4  ;;  %v955_v6 = vmul.f32 %v1807_v57, %v2021_v9  ;;  %v1023_v8 = vmul.f32 %v1809_v58, %v2069_v3  ;;  %v2117_v11 = vld [vmem:[#allocation2 + $0xc2] sm:$0xff] }
  0xb2   : > { %v919_v35 = vadd.f32 %v887_v55, %v815_v0  ;;  %v748_v63 = vadd.f32 %v716_v14, %v680_v37  ;;  %v717_v25 = vmul.f32 %v1800_v51, %v1731_v15  ;;  %v442_v12 = vadd.f32 %v1788_v42, %v410_v52 }
  0xb3   : > { %1086 = vst [vmem:[%s1897_s24 + $0x48] sm:$0xff] %v1054_v29  ;;  %v577_v30 = vadd.f32 %v545_v27, %v509_v40  ;;  %v478_v62 = vmul.f32 %v1790_v44, %v2040_v34  ;;  %v888_v46 = vmul.f32 %v1802_v53, %v1997_v33  ;;  %v785_v28 = vmul.f32 %v1805_v56, %v1737_v17 }
  0xb4   : > { %v987_v10 = vadd.f32 %v955_v6, %v919_v35  ;;  %v816_v48 = vadd.f32 %v784_v59, %v748_v63  ;;  %v546_v5 = vmul.f32 %v1792_v45, %v2088_v60  ;;  %v650_v39 = vmul.f32 %v1798_v50, %v1725_v13 }
  0xb5   : > { %v681_v31 = vadd.f32 %v649_v32, %v577_v30  ;;  %v510_v24 = vadd.f32 %v478_v62, %v442_v12  ;;  %v956_v26 = vmul.f32 %v1807_v57, %v2048_v54  ;;  %v411_v33 = vmul.f32 %v1783_v41, %v2018_v38  ;;  %v2144_v62 = vld [vmem:[#allocation2 + $0xca] sm:$0xff] }
  0xb6   : > { %v1055_v49 = vadd.f32 %v1023_v8, %v987_v10  ;;  %v920_v43 = vadd.f32 %v888_v46, %v816_v48  ;;  %v1024_v7 = vmul.f32 %v1809_v58, %v2096_v23  ;;  %v718_v14 = vmul.f32 %v1800_v51, %v1734_v16  ;;  %v2136_v8 = vld [vmem:[#allocation2 + $0xe0] sm:$0xff] }
  0xb7   : > { %v749_v61 = vadd.f32 %v717_v25, %v681_v31  ;;  %v578_v1 = vadd.f32 %v546_v5, %v510_v24  ;;  %v889_v55 = vmul.f32 %v1802_v53, %v2021_v9  ;;  %v443_v4 = vadd.f32 %v1788_v42, %v411_v33 }
  0xb8   : > { %1087 = vst [vmem:[%s1897_s24 + $0x50] sm:$0xff] %v1055_v49  ;;  %v988_v13 = vadd.f32 %v956_v26, %v920_v43  ;;  %v479_v38 = vmul.f32 %v1790_v44, %v2060_v36  ;;  %v786_v37 = vmul.f32 %v1805_v56, %v1743_v18  ;;  %v547_v59 = vmul.f32 %v1792_v45, %v2108_v47  ;;  %v2156_v43 = vld [vmem:[#allocation2 + $0xf0] sm:$0xff] }
  0xb9   : > { %v817_v2 = vadd.f32 %v785_v28, %v749_v61  ;;  %v682_v0 = vadd.f32 %v650_v39, %v578_v1  ;;  %v651_v40 = vmul.f32 %v1798_v50, %v1731_v15  ;;  %v412_v9 = vmul.f32 %v1783_v41, %v2040_v34  ;;  %v2165_v1 = vld [vmem:[#allocation2 + $0xda] sm:$0xff] }
  0xba   : > { %v1056_v27 = vadd.f32 %v1024_v7, %v988_v13  ;;  %v511_v29 = vadd.f32 %v479_v38, %v443_v4  ;;  %v957_v52 = vmul.f32 %v1807_v57, %v2069_v3  ;;  %v1025_v35 = vmul.f32 %v1809_v58, %v2117_v11 }
  0xbb   : > { %v921_v32 = vadd.f32 %v889_v55, %v817_v2  ;;  %v750_v6 = vadd.f32 %v718_v14, %v682_v0  ;;  %v719_v30 = vmul.f32 %v1800_v51, %v1737_v17  ;;  %v444_v15 = vadd.f32 %v1788_v42, %v412_v9 }
  0xbc   : > { %1088 = vst [vmem:[%s1897_s24 + $0x58] sm:$0xff] %v1056_v27  ;;  %v579_v63 = vadd.f32 %v547_v59, %v511_v29  ;;  %v480_v34 = vmul.f32 %v1790_v44, %v2088_v60  ;;  %v890_v10 = vmul.f32 %v1802_v53, %v2048_v54  ;;  %v787_v48 = vmul.f32 %v1805_v56, %v1746_v19 }
  0xbd   : > { %v989_v25 = vadd.f32 %v957_v52, %v921_v32  ;;  %v818_v12 = vadd.f32 %v786_v37, %v750_v6  ;;  %v548_v31 = vmul.f32 %v1792_v45, %v2136_v8  ;;  %v652_v24 = vmul.f32 %v1798_v50, %v1734_v16  ;;  %v2184_v32 = vld [vmem:[#allocation2 + $0xf8] sm:$0xff] }
  0xbe   : > { %v683_v46 = vadd.f32 %v651_v40, %v579_v63  ;;  %v512_v28 = vadd.f32 %v480_v34, %v444_v15  ;;  %v958_v49 = vmul.f32 %v1807_v57, %v2096_v23  ;;  %v413_v54 = vmul.f32 %v1783_v41, %v2060_v36 }
  0xbf   : > { %v1057_v5 = vadd.f32 %v1025_v35, %v989_v25  ;;  %v922_v39 = vadd.f32 %v890_v10, %v818_v12  ;;  %v1026_v26 = vmul.f32 %v1809_v58, %v2144_v62  ;;  %v720_v61 = vmul.f32 %v1800_v51, %v1743_v18 }
  0xc0   : > { %v751_v33 = vadd.f32 %v719_v30, %v683_v46  ;;  %v580_v7 = vadd.f32 %v548_v31, %v512_v28  ;;  %v891_v14 = vmul.f32 %v1802_v53, %v2069_v3  ;;  %v445_v13 = vadd.f32 %v1788_v42, %v413_v54  ;;  %v2192_v30 = vld [vmem:[#allocation2 + $0xe2] sm:$0xff] }
  0xc1   : > { %1089 = vst [vmem:[%s1897_s24 + $0x60] sm:$0xff] %v1057_v5  ;;  %v990_v16 = vadd.f32 %v958_v49, %v922_v39  ;;  %v481_v36 = vmul.f32 %v1790_v44, %v2108_v47  ;;  %v788_v38 = vmul.f32 %v1805_v56, %v1749_v20  ;;  %v549_v2 = vmul.f32 %v1792_v45, %v2156_v43 }
  0xc2   : > { %v819_v55 = vadd.f32 %v787_v48, %v751_v33  ;;  %v684_v4 = vadd.f32 %v652_v24, %v580_v7  ;;  %v653_v59 = vmul.f32 %v1798_v50, %v1737_v17  ;;  %v414_v3 = vmul.f32 %v1783_v41, %v2088_v60  ;;  %v2204_v24 = vld [vmem:[#allocation2 + $0x108] sm:$0xff] }
  0xc3   : > { %v1058_v0 = vadd.f32 %v1026_v26, %v990_v16  ;;  %v513_v37 = vadd.f32 %v481_v36, %v445_v13  ;;  %v959_v29 = vmul.f32 %v1807_v57, %v2117_v11  ;;  %v1027_v40 = vmul.f32 %v1809_v58, %v2165_v1  ;;  %v2213_v26 = vld [vmem:[#allocation2 + $0xf2] sm:$0xff] }
  0xc4   : > { %v923_v27 = vadd.f32 %v891_v14, %v819_v55  ;;  %v752_v9 = vadd.f32 %v720_v61, %v684_v4  ;;  %v721_v35 = vmul.f32 %v1800_v51, %v1746_v19  ;;  %v446_v17 = vadd.f32 %v1788_v42, %v414_v3 }
  0xc5   : > { %1090 = vst [vmem:[%s1897_s24 + $0x68] sm:$0xff] %v1058_v0  ;;  %v581_v52 = vadd.f32 %v549_v2, %v513_v37  ;;  %v482_v60 = vmul.f32 %v1790_v44, %v2136_v8  ;;  %v892_v15 = vmul.f32 %v1802_v53, %v2096_v23  ;;  %v789_v34 = vmul.f32 %v1805_v56, %v1755_v21 }
  0xc6   : > { %v991_v6 = vadd.f32 %v959_v29, %v923_v27  ;;  %v820_v63 = vadd.f32 %v788_v38, %v752_v9  ;;  %v550_v10 = vmul.f32 %v1792_v45, %v2184_v32  ;;  %v654_v48 = vmul.f32 %v1798_v50, %v1743_v18  ;;  %v2240_v9 = vld [vmem:[#allocation2 + $0xfa] sm:$0xff] }
  0xc7   : > { %v685_v25 = vadd.f32 %v653_v59, %v581_v52  ;;  %v514_v12 = vadd.f32 %v482_v60, %v446_v17  ;;  %v960_v31 = vmul.f32 %v1807_v57, %v2144_v62  ;;  %v415_v23 = vmul.f32 %v1783_v41, %v2108_v47  ;;  %v2232_v59 = vld [vmem:[#allocation2 + $0x110] sm:$0xff] }
  0xc8   : > { %v1059_v46 = vadd.f32 %v1027_v40, %v991_v6  ;;  %v924_v28 = vadd.f32 %v892_v15, %v820_v63  ;;  %v1028_v5 = vmul.f32 %v1809_v58, %v2192_v30  ;;  %v722_v54 = vmul.f32 %v1800_v51, %v1749_v20 }
  0xc9   : > { %v753_v39 = vadd.f32 %v721_v35, %v685_v25  ;;  %v582_v49 = vadd.f32 %v550_v10, %v514_v12  ;;  %v893_v33 = vmul.f32 %v1802_v53, %v2117_v11  ;;  %v447_v7 = vadd.f32 %v1788_v42, %v415_v23  ;;  %v2634_v35 = vld [vmem:[#allocation12_spill] sm:$0xff]  ;;  %v2261_v23 = vld [vmem:[#allocation2 + $0x10a] sm:$0xff] }
  0xca   : > { %1091 = vst [vmem:[%s1897_s24 + $0x70] sm:$0xff] %v1059_v46  ;;  %v992_v18 = vadd.f32 %v960_v31, %v924_v28  ;;  %v483_v47 = vmul.f32 %v1790_v44, %v2156_v43  ;;  %v790_v14 = vmul.f32 %v1805_v56, %v1758_v22  ;;  %v551_v13 = vmul.f32 %v1792_v45, %v2204_v24  ;;  %v2252_v10 = vld [vmem:[#allocation2 + $0x120] sm:$0xff] }
  0xcb   : > { %v821_v61 = vadd.f32 %v789_v34, %v753_v39  ;;  %v686_v16 = vadd.f32 %v654_v48, %v582_v49  ;;  %v655_v4 = vmul.f32 %v1798_v50, %v1746_v19  ;;  %v416_v11 = vmul.f32 %v1783_v41, %v2136_v8 }
  0xcc   : > { %v1060_v36 = vadd.f32 %v1028_v5, %v992_v18  ;;  %v515_v55 = vadd.f32 %v483_v47, %v447_v7  ;;  %v961_v2 = vmul.f32 %v1807_v57, %v2165_v1  ;;  %v1029_v0 = vmul.f32 %v1809_v58, %v2213_v26  ;;  %v2635_v18 = vld [vmem:[#allocation13_spill] sm:$0xff] }
  0xcd   : > { %v925_v38 = vadd.f32 %v893_v33, %v821_v61  ;;  %v754_v37 = vadd.f32 %v722_v54, %v686_v16  ;;  %v723_v27 = vmul.f32 %v1800_v51, %v1755_v21  ;;  %v448_v19 = vadd.f32 %v1788_v42, %v416_v11 }
  0xce   : > { %1092 = vst [vmem:[%s1897_s24 + $0x78] sm:$0xff] %v1060_v36  ;;  %v583_v3 = vadd.f32 %v551_v13, %v515_v55  ;;  %v484_v8 = vmul.f32 %v1790_v44, %v2184_v32  ;;  %v894_v52 = vmul.f32 %v1802_v53, %v2144_v62  ;;  %v791_v17 = vmul.f32 %v1805_v56, %v2634_v35 }
  0xcf   : > { %v993_v29 = vadd.f32 %v961_v2, %v925_v38  ;;  %v822_v40 = vadd.f32 %v790_v14, %v754_v37  ;;  %v552_v63 = vmul.f32 %v1792_v45, %v2232_v59  ;;  %v656_v15 = vmul.f32 %v1798_v50, %v1749_v20 }
  0xd0   : > { %v687_v60 = vadd.f32 %v655_v4, %v583_v3  ;;  %v516_v6 = vadd.f32 %v484_v8, %v448_v19  ;;  %v962_v12 = vmul.f32 %v1807_v57, %v2192_v30  ;;  %v417_v62 = vmul.f32 %v1783_v41, %v2156_v43  ;;  %v2280_v4 = vld [vmem:[#allocation2 + $0x128] sm:$0xff]  ;;  %v2292_v19 = vld [vmem:[#allocation2 + $0x112] sm:$0xff] }
  0xd1   : > { %v1061_v34 = vadd.f32 %v1029_v0, %v993_v29  ;;  %v926_v25 = vadd.f32 %v894_v52, %v822_v40  ;;  %v1030_v48 = vmul.f32 %v1809_v58, %v2240_v9  ;;  %v724_v31 = vmul.f32 %v1800_v51, %v1758_v22  ;;  %v2636_v3 = vld [vmem:[#allocation14_spill] sm:$0xff] }
  0xd2   : > { %v755_v46 = vadd.f32 %v723_v27, %v687_v60  ;;  %v584_v28 = vadd.f32 %v552_v63, %v516_v6  ;;  %v895_v5 = vmul.f32 %v1802_v53, %v2165_v1  ;;  %v449_v39 = vadd.f32 %v1788_v42, %v417_v62  ;;  %v2300_v63 = vld [vmem:[#allocation2 + $0x138] sm:$0xff]  ;;  %v2309_v62 = vld [vmem:[#allocation2 + $0x129] sm:$0xff] }
  0xd3   : > { %1093 = vst [vmem:[%s1897_s24 + $0x80] sm:$0xff] %v1061_v34  ;;  %v994_v20 = vadd.f32 %v962_v12, %v926_v25  ;;  %v485_v43 = vmul.f32 %v1790_v44, %v2204_v24  ;;  %v792_v33 = vmul.f32 %v1805_v56, %v2635_v18  ;;  %v553_v7 = vmul.f32 %v1792_v45, %v2252_v10 }
  0xd4   : > { %v823_v49 = vadd.f32 %v791_v17, %v755_v46  ;;  %v688_v54 = vadd.f32 %v656_v15, %v584_v28  ;;  %v657_v16 = vmul.f32 %v1798_v50, %v1755_v21  ;;  %v418_v1 = vmul.f32 %v1783_v41, %v2184_v32 }
  0xd5   : > { %v1062_v47 = vadd.f32 %v1030_v48, %v994_v20  ;;  %v517_v61 = vadd.f32 %v485_v43, %v449_v39  ;;  %v963_v13 = vmul.f32 %v1807_v57, %v2213_v26  ;;  %v1031_v36 = vmul.f32 %v1809_v58, %v2261_v23  ;;  %v2318_v39 = vld [vmem:[#allocation2 + $0x122] sm:$0xff] }
  0xd6   : > { %v927_v14 = vadd.f32 %v895_v5, %v823_v49  ;;  %v756_v55 = vadd.f32 %v724_v31, %v688_v54  ;;  %v725_v38 = vmul.f32 %v1800_v51, %v2634_v35  ;;  %v450_v21 = vadd.f32 %v1788_v42, %v418_v1 }
  0xd7   : > { %1094 = vst [vmem:[%s1897_s24 + $0x88] sm:$0xff] %v1062_v47  ;;  %v585_v11 = vadd.f32 %v553_v7, %v517_v61  ;;  %v486_v32 = vmul.f32 %v1790_v44, %v2232_v59  ;;  %v896_v37 = vmul.f32 %v1802_v53, %v2192_v30  ;;  %v793_v27 = vmul.f32 %v1805_v56, %v2636_v3  ;;  %v2328_v47 = vld [vmem:[#allocation2 + $0x140] sm:$0xff] }
  0xd8   : > { %v995_v2 = vadd.f32 %v963_v13, %v927_v14  ;;  %v824_v0 = vadd.f32 %v792_v33, %v756_v55  ;;  %v554_v40 = vmul.f32 %v1792_v45, %v2280_v4  ;;  %v658_v52 = vmul.f32 %v1798_v50, %v1758_v22 }
  0xd9   : > { %v689_v8 = vadd.f32 %v657_v16, %v585_v11  ;;  %v518_v29 = vadd.f32 %v486_v32, %v450_v21  ;;  %v964_v6 = vmul.f32 %v1807_v57, %v2240_v9  ;;  %v419_v30 = vmul.f32 %v1783_v41, %v2204_v24  ;;  %v2342_v11 = vld [vmem:[#allocation2 + $0x139] sm:$0xff] }
  0xda   : > { %v1063_v17 = vadd.f32 %v1031_v36, %v995_v2  ;;  %v928_v60 = vadd.f32 %v896_v37, %v824_v0  ;;  %v726_v25 = vmul.f32 %v1800_v51, %v2635_v18  ;;  %v1032_v22 = vmul.f32 %v1809_v58, %v2292_v19  ;;  %v2338_v36 = vld [vmem:[#allocation2 + $0x12a] sm:$0xff] }
  0xdb   : > { %v757_v15 = vadd.f32 %v725_v38, %v689_v8  ;;  %v586_v34 = vadd.f32 %v554_v40, %v518_v29  ;;  %v451_v48 = vadd.f32 %v1788_v42, %v419_v30  ;;  %v487_v46 = vmul.f32 %v1790_v44, %v2252_v10  ;;  %v1334_v2 = vld [vmem:[#allocation2 + $0x111] sm:$0xff]  ;;  %v2360_v30 = vld [vmem:[#allocation2 + $0x141] sm:$0xff] }
  0xdc   : > { %1095 = vst [vmem:[%s1897_s24 + $0x90] sm:$0xff] %v1063_v17  ;;  %v996_v12 = vadd.f32 %v964_v6, %v928_v60  ;;  %v897_v24 = vmul.f32 %v1802_v53, %v2213_v26  ;;  %v555_v20 = vmul.f32 %v1792_v45, %v2300_v63  ;;  %v659_v49 = vmul.f32 %v1798_v50, %v2634_v35  ;;  %v2349_v8 = vld [vmem:[#allocation2 + $0x150] sm:$0xff] }
  0xdd   : > { %v825_v28 = vadd.f32 %v793_v27, %v757_v15  ;;  %v690_v31 = vadd.f32 %v658_v52, %v586_v34  ;;  %v519_v43 = vadd.f32 %v487_v46, %v451_v48  ;;  %v420_v54 = vmul.f32 %v1783_v41, %v2232_v59 }
  0xde   : > { %v1064_v5 = vadd.f32 %v1032_v22, %v996_v12  ;;  %v965_v33 = vmul.f32 %v1807_v57, %v2261_v23  ;;  %v794_v26 = vmul.f32 %v1805_v56, %v2309_v62  ;;  %v727_v16 = vmul.f32 %v1800_v51, %v2636_v3 }
  0xdf   : > { %v929_v18 = vadd.f32 %v897_v24, %v825_v28  ;;  %v758_v7 = vadd.f32 %v726_v25, %v690_v31  ;;  %v587_v61 = vadd.f32 %v555_v20, %v519_v43  ;;  %v452_v35 = vadd.f32 %v1788_v42, %v420_v54  ;;  %v2365_v25 = vld [vmem:[#allocation2 + $0x13a] sm:$0xff] }
  0xe0   : > { %1096 = vst [vmem:[%s1897_s24 + $0x98] sm:$0xff] %v1064_v5  ;;  %v488_v59 = vmul.f32 %v1790_v44, %v2280_v4  ;;  %v1033_v14 = vmul.f32 %v1809_v58, %v2318_v39  ;;  %v898_v55 = vmul.f32 %v1802_v53, %v2240_v9  ;;  %v556_v32 = vmul.f32 %v1792_v45, %v2328_v47  ;;  %v1335_v28 = vld [vmem:[#allocation2 + $0x121] sm:$0xff] }
  0xe1   : > { %v997_v1 = vadd.f32 %v965_v33, %v929_v18  ;;  %v826_v13 = vadd.f32 %v794_v26, %v758_v7  ;;  %v691_v38 = vadd.f32 %v659_v49, %v587_v61  ;;  %v660_v0 = vmul.f32 %v1334_v2, %v1798_v50  ;;  %v2378_v49 = vld [vmem:[#allocation2 + $0x158] sm:$0xff]  ;;  %v2383_v18 = vld [vmem:[#allocation2 + $0x142] sm:$0xff] }
  0xe2   : > { %v520_v21 = vadd.f32 %v488_v59, %v452_v35  ;;  %v966_v27 = vmul.f32 %v1807_v57, %v2292_v19  ;;  %v421_v9 = vmul.f32 %v1783_v41, %v2252_v10  ;;  %v1034_v29 = vmul.f32 %v1809_v58, %v2338_v36 }
  0xe3   : > { %v1065_v37 = vadd.f32 %v1033_v14, %v997_v1  ;;  %v930_v3 = vadd.f32 %v898_v55, %v826_v13  ;;  %v759_v40 = vadd.f32 %v727_v16, %v691_v38  ;;  %v795_v52 = vmul.f32 %v1805_v56, %v2342_v11  ;;  %v2397_v1 = vld [vmem:[#allocation2 + $0x151] sm:$0xff] }
  0xe4   : > { %v588_v17 = vadd.f32 %v556_v32, %v520_v21  ;;  %v899_v6 = vmul.f32 %v1802_v53, %v2261_v23  ;;  %v453_v15 = vadd.f32 %v1788_v42, %v421_v9  ;;  %v489_v10 = vmul.f32 %v1790_v44, %v2300_v63  ;;  %v2411_v9 = vld [vmem:[#allocation2 + $0x168] sm:$0xff] }
  0xe5   : > { %1097 = vst [vmem:[%s1897_s24 + $0xa0] sm:$0xff] %v1065_v37  ;;  %v998_v60 = vadd.f32 %v966_v27, %v930_v3  ;;  %v827_v34 = vadd.f32 %v795_v52, %v759_v40  ;;  %v728_v22 = vmul.f32 %v1800_v51, %v2309_v62  ;;  %v557_v48 = vmul.f32 %v1792_v45, %v2349_v8  ;;  %v2414_v40 = vld [vmem:[#allocation2 + $0x152] sm:$0xff] }
  0xe6   : > { %v692_v12 = vadd.f32 %v660_v0, %v588_v17  ;;  %v521_v23 = vadd.f32 %v489_v10, %v453_v15  ;;  %v661_v24 = vmul.f32 %v1335_v28, %v1798_v50  ;;  %v422_v42 = vmul.f32 %v1783_v41, %v2280_v4  ;;  %v2388_v4 = vld [vmem:[%s2606_s2] ss:$0 sm:$0xff] }
  0xe7   : > { %v1066_v46 = vadd.f32 %v1034_v29, %v998_v60  ;;  %v931_v31 = vadd.f32 %v899_v6, %v827_v34  ;;  %v967_v20 = vmul.f32 %v1807_v57, %v2318_v39  ;;  %v796_v43 = vmul.f32 %v1805_v56, %v2360_v30  ;;  %v2418_v17 = vld [vmem:[#allocation2 + $0x159] sm:$0xff] }
  0xe8   : > { %v760_v5 = vadd.f32 %v728_v22, %v692_v12  ;;  %v1035_v54 = vmul.f32 %v1809_v58, %v2365_v25  ;;  %v589_v33 = vadd.f32 %v557_v48, %v521_v23  ;;  %v454_v7 = vadd.f32 %v2388_v4, %v422_v42  ;;  %v2438_v42 = vld [vmem:[#allocation2 + $0x15a] sm:$0xff] }
  0xe9   : > { %1098 = vst [vmem:[%s1897_s24 + $0xa8] sm:$0xff] %v1066_v46  ;;  %v490_v26 = vmul.f32 %v1790_v44, %v2328_v47  ;;  %v999_v61 = vadd.f32 %v967_v20, %v931_v31  ;;  %v900_v35 = vmul.f32 %v1802_v53, %v2292_v19  ;;  %v968_v59 = vmul.f32 %v1807_v57, %v2338_v36 }
  0xea   : > { %v828_v16 = vadd.f32 %v796_v43, %v760_v5  ;;  %v693_v14 = vadd.f32 %v661_v24, %v589_v33  ;;  %v729_v13 = vmul.f32 %v1800_v51, %v2342_v11  ;;  %v558_v38 = vmul.f32 %v1792_v45, %v2378_v49  ;;  %v2435_v24 = vld [vmem:[#allocation2 + $0x170] sm:$0xff] }
  0xeb   : > { %v522_v55 = vadd.f32 %v490_v26, %v454_v7  ;;  %v1067_v21 = vadd.f32 %v1035_v54, %v999_v61  ;;  %v1036_v2 = vmul.f32 %v1809_v58, %v2383_v18  ;;  %v423_v19 = vmul.f32 %v1783_v41, %v2300_v63  ;;  %v2449_v26 = vld [vmem:[#allocation2 + $0x169] sm:$0xff] }
  0xec   : > { %v932_v32 = vadd.f32 %v900_v35, %v828_v16  ;;  %v761_v0 = vadd.f32 %v729_v13, %v693_v14  ;;  %v797_v37 = vmul.f32 %v1805_v56, %v2397_v1  ;;  %v662_v27 = vmul.f32 %v1798_v50, %v2309_v62 }
  0xed   : > { %v590_v3 = vadd.f32 %v558_v38, %v522_v55  ;;  %1099 = vst [vmem:[%s1897_s24 + $0xb0] sm:$0xff] %v1067_v21  ;;  %v901_v52 = vmul.f32 %v1802_v53, %v2318_v39  ;;  %v455_v63 = vadd.f32 %v2388_v4, %v423_v19  ;;  %v491_v60 = vmul.f32 %v1790_v44, %v2349_v8 }
  0xee   : > { %v1000_v29 = vadd.f32 %v968_v59, %v932_v32  ;;  %v829_v6 = vadd.f32 %v797_v37, %v761_v0  ;;  %v969_v62 = vmul.f32 %v1807_v57, %v2365_v25  ;;  %v730_v10 = vmul.f32 %v1800_v51, %v2360_v30  ;;  %v2464_v0 = vld [vmem:[#allocation2 + $0x16a] sm:$0xff] }
  0xef   : > { %v694_v15 = vadd.f32 %v662_v27, %v590_v3  ;;  %v523_v12 = vadd.f32 %v491_v60, %v455_v63  ;;  %v559_v39 = vmul.f32 %v1792_v45, %v2411_v9  ;;  %v424_v22 = vmul.f32 %v1783_v41, %v2328_v47  ;;  %v2468_v3 = vld [vmem:[#allocation2 + $0x171] sm:$0xff] }
  0xf0   : > { %v1068_v34 = vadd.f32 %v1036_v2, %v1000_v29  ;;  %v933_v48 = vadd.f32 %v901_v52, %v829_v6  ;;  %v1037_v46 = vmul.f32 %v1809_v58, %v2414_v40  ;;  %v798_v28 = vmul.f32 %v1805_v56, %v2418_v17  ;;  %v389_v2 = vld [vmem:[#allocation2 + $0x180] sm:$0xff] }
  0xf1   : > { %v762_v23 = vadd.f32 %v730_v10, %v694_v15  ;;  %v591_v31 = vadd.f32 %v559_v39, %v523_v12  ;;  %v663_v20 = vmul.f32 %v1798_v50, %v2342_v11  ;;  %v456_v5 = vadd.f32 %v2388_v4, %v424_v22  ;;  %v390_v39 = vld [vmem:[#allocation2 + $0x188] sm:$0xff] }
  0xf2   : > { %1100 = vst [vmem:[%s1897_s24 + $0xb8] sm:$0xff] %v1068_v34  ;;  %v492_v47 = vmul.f32 %v1790_v44, %v2378_v49  ;;  %v1001_v43 = vadd.f32 %v969_v62, %v933_v48  ;;  %v902_v33 = vmul.f32 %v1802_v53, %v2338_v36  ;;  %v970_v7 = vmul.f32 %v1807_v57, %v2383_v18 }
  0xf3   : > { %v830_v54 = vadd.f32 %v798_v28, %v762_v23  ;;  %v695_v61 = vadd.f32 %v663_v20, %v591_v31  ;;  %v731_v11 = vmul.f32 %v1800_v51, %v2397_v1  ;;  %v560_v35 = vmul.f32 %v1792_v45, %v2435_v24 }
  0xf4   : > { %v524_v16 = vadd.f32 %v492_v47, %v456_v5  ;;  %v1069_v59 = vadd.f32 %v1037_v46, %v1001_v43  ;;  %v1038_v13 = vmul.f32 %v1809_v58, %v2438_v42  ;;  %v425_v36 = vmul.f32 %v1783_v41, %v2349_v8  ;;  %v629_v5 = vld [vmem:[#allocation2 + $0x181] sm:$0xff]  ;;  %v2494_v47 = vld [vmem:[#allocation2 + $0x172] sm:$0xff] }
  0xf5   : > { %v934_v14 = vadd.f32 %v902_v33, %v830_v54  ;;  %v763_v55 = vadd.f32 %v731_v11, %v695_v61  ;;  %v799_v38 = vmul.f32 %v1805_v56, %v2449_v26  ;;  %v664_v32 = vmul.f32 %v1798_v50, %v2360_v30 }
  0xf6   : > { %v592_v21 = vadd.f32 %v560_v35, %v524_v16  ;;  %1101 = vst [vmem:[%s1897_s24 + $0xc0] sm:$0xff] %v1069_v59  ;;  %v903_v37 = vmul.f32 %v1802_v53, %v2365_v25  ;;  %v457_v8 = vadd.f32 %v2388_v4, %v425_v36  ;;  %v493_v27 = vmul.f32 %v1790_v44, %v2411_v9 }
  0xf7   : > { %v1002_v19 = vadd.f32 %v970_v7, %v934_v14  ;;  %v831_v29 = vadd.f32 %v799_v38, %v763_v55  ;;  %v971_v30 = vmul.f32 %v1807_v57, %v2414_v40  ;;  %v732_v63 = vmul.f32 %v1800_v51, %v2418_v17  ;;  %v630_v55 = vld [vmem:[#allocation2 + $0x189] sm:$0xff] }
  0xf8   : > { %v696_v52 = vadd.f32 %v664_v32, %v592_v21  ;;  %v525_v6 = vadd.f32 %v493_v27, %v457_v8  ;;  %v561_v25 = vmul.f32 %v1792_v45, %v389_v2  ;;  %v426_v62 = vmul.f32 %v1783_v41, %v2378_v49  ;;  %v1337_v21 = vld [vmem:[#allocation2] sm:$0xff] }
  0xf9   : > { %v1070_v60 = vadd.f32 %v1038_v13, %v1002_v19  ;;  %v935_v15 = vadd.f32 %v903_v37, %v831_v29  ;;  %v1039_v10 = vmul.f32 %v1809_v58, %v2464_v0  ;;  %v800_v12 = vmul.f32 %v1805_v56, %v2468_v3  ;;  %v869_v8 = vld [vmem:[#allocation2 + $0x182] sm:$0xff] }
  0xfa   : > { %v764_v34 = vadd.f32 %v732_v63, %v696_v52  ;;  %v593_v22 = vadd.f32 %v561_v25, %v525_v6  ;;  %v665_v48 = vmul.f32 %v1798_v50, %v2397_v1  ;;  %v458_v46 = vadd.f32 %v2388_v4, %v426_v62 }
  0xfb   : > { %1102 = vst [vmem:[%s1897_s24 + $0xc8] sm:$0xff] %v1070_v60  ;;  %v494_v23 = vmul.f32 %v1790_v44, %v2435_v24  ;;  %v1003_v49 = vadd.f32 %v971_v30, %v935_v15  ;;  %v904_v31 = vmul.f32 %v1802_v53, %v2383_v18  ;;  %v972_v20 = vmul.f32 %v1807_v57, %v2438_v42  ;;  %v631_v60 = vld [vmem:[#allocation2 + $0x199] sm:$0xff] }
  0xfc   : > { %v832_v28 = vadd.f32 %v800_v12, %v764_v34  ;;  %v697_v43 = vadd.f32 %v665_v48, %v593_v22  ;;  %v733_v1 = vmul.f32 %v1800_v51, %v2449_v26  ;;  %v562_v33 = vmul.f32 %v1792_v45, %v390_v39 }
  0xfd   : > { %v526_v54 = vadd.f32 %v494_v23, %v458_v46  ;;  %v1071_v7 = vadd.f32 %v1039_v10, %v1003_v49  ;;  %v427_v11 = vmul.f32 %v1783_v41, %v2411_v9  ;;  %v495_v18 = vmul.f32 %v1790_v44, %v389_v2 }
  0xfe   : > { %v936_v61 = vadd.f32 %v904_v31, %v832_v28  ;;  %v765_v16 = vadd.f32 %v733_v1, %v697_v43  ;;  %v801_v35 = vmul.f32 %v1805_v56, %v629_v5  ;;  %v666_v14 = vmul.f32 %v1798_v50, %v2418_v17 }
  0xff   : > { %v594_v59 = vadd.f32 %v562_v33, %v526_v54  ;;  %1103 = vst [vmem:[%s1897_s24 + $0xd0] sm:$0xff] %v1071_v7  ;;  %v1040_v36 = vmul.f32 %v1809_v58, %v2494_v47  ;;  %v459_v38 = vadd.f32 %v2388_v4, %v427_v11  ;;  %v563_v9 = vmul.f32 %v1337_v21, %v1792_v45  ;;  %v871_v7 = vld [vmem:[#allocation2 + $0x19a] sm:$0xff] }
 0x100   : > { %v1004_v13 = vadd.f32 %v972_v20, %v936_v61  ;;  %v833_v32 = vadd.f32 %v801_v35, %v765_v16  ;;  %v905_v2 = vmul.f32 %v1802_v53, %v2414_v40  ;;  %v734_v17 = vmul.f32 %v1800_v51, %v2468_v3  ;;  %v872_v16 = vld [vmem:[#allocation2 + $0x1a2] sm:$0xff] }
 0x101   : > { %v698_v19 = vadd.f32 %v666_v14, %v594_v59  ;;  %v973_v27 = vmul.f32 %v1807_v57, %v2464_v0  ;;  %v527_v29 = vadd.f32 %v495_v18, %v459_v38  ;;  %v428_v30 = vmul.f32 %v1783_v41, %v2435_v24  ;;  %v870_v24 = vld [vmem:[#allocation2 + $0x18a] sm:$0xff] }
 0x102   : > { %v1072_v37 = vadd.f32 %v1040_v36, %v1004_v13  ;;  %v937_v52 = vadd.f32 %v905_v2, %v833_v32  ;;  %v802_v45 = vmul.f32 %v1805_v56, %v630_v55  ;;  %v496_v40 = vmul.f32 %v1790_v44, %v390_v39 }
 0x103   : > { %v766_v63 = vadd.f32 %v734_v17, %v698_v19  ;;  %v595_v6 = vadd.f32 %v563_v9, %v527_v29  ;;  %v667_v25 = vmul.f32 %v1798_v50, %v2449_v26  ;;  %v460_v62 = vadd.f32 %v2388_v4, %v428_v30  ;;  %v632_v26 = vld [vmem:[#allocation2 + $0x1a1] sm:$0xff] }
 0x104   : > { %1104 = vst [vmem:[%s1897_s24 + $0xd8] sm:$0xff] %v1072_v37  ;;  %v1005_v15 = vadd.f32 %v973_v27, %v937_v52  ;;  %v1041_v10 = vmul.f32 %v1809_v58, %v869_v8  ;;  %v906_v41 = vmul.f32 %v1802_v53, %v2438_v42  ;;  %v735_v22 = vmul.f32 %v1800_v51, %v629_v5 }
 0x105   : > { %v834_v34 = vadd.f32 %v802_v45, %v766_v63  ;;  %v699_v12 = vadd.f32 %v667_v25, %v595_v6  ;;  %v803_v44 = vmul.f32 %v1805_v56, %v631_v60  ;;  %v528_v39 = vadd.f32 %v496_v40, %v460_v62 }
 0x106   : > { %v1073_v48 = vadd.f32 %v1041_v10, %v1005_v15  ;;  %v974_v4 = vmul.f32 %v1807_v57, %v2494_v47  ;;  %v668_v28 = vmul.f32 %v1798_v50, %v2468_v3  ;;  %v1042_v31 = vmul.f32 %v1809_v58, %v870_v24 }
 0x107   : > { %v938_v46 = vadd.f32 %v906_v41, %v834_v34  ;;  %v767_v23 = vadd.f32 %v735_v22, %v699_v12  ;;  %v596_v49 = vadd.f32 %v563_v9, %v528_v39  ;;  %v907_v20 = vmul.f32 %v1802_v53, %v2464_v0 }
 0x108   : > { %1105 = vst [vmem:[%s1897_s24 + $0xe0] sm:$0xff] %v1073_v48  ;;  %v736_v1 = vmul.f32 %v1800_v51, %v630_v55  ;;  %v804_v54 = vmul.f32 %v1805_v56, %v632_v26  ;;  %v975_v50 = vmul.f32 %v1807_v57, %v869_v8  ;;  %v1043_v0 = vmul.f32 %v1809_v58, %v871_v7 }
 0x109   : > { %v1006_v42 = vadd.f32 %v974_v4, %v938_v46  ;;  %v835_v5 = vadd.f32 %v803_v44, %v767_v23  ;;  %v700_v43 = vadd.f32 %v668_v28, %v596_v49  ;;  %v908_v51 = vmul.f32 %v1802_v53, %v2494_v47 }
 0x10a   : > { %v976_v59 = vmul.f32 %v1807_v57, %v870_v24  ;;  %v1044_v13 = vmul.f32 %v1809_v58, %v872_v16 }
 0x10b   : > { %v1074_v33 = vadd.f32 %v1042_v31, %v1006_v42  ;;  %v939_v61 = vadd.f32 %v907_v20, %v835_v5  ;;  %v768_v3 = vadd.f32 %v736_v1, %v700_v43 }
 0x10d   : > { %1106 = vst [vmem:[%s1897_s24 + $0xe8] sm:$0xff] %v1074_v33  ;;  %v1007_v11 = vadd.f32 %v975_v50, %v939_v61  ;;  %v836_v18 = vadd.f32 %v804_v54, %v768_v3 }
 0x10f   : > { %v1075_v56 = vadd.f32 %v1043_v0, %v1007_v11  ;;  %v940_v35 = vadd.f32 %v908_v51, %v836_v18 }
 0x111   : > { %1107 = vst [vmem:[%s1897_s24 + $0xf0] sm:$0xff] %v1075_v56  ;;  %v1008_v14 = vadd.f32 %v976_v59, %v940_v35 }
 0x113   : > { %v1076_v53 = vadd.f32 %v1044_v13, %v1008_v14 }
 0x115   : > { %1108 = vst [vmem:[%s1897_s24 + $0xf8] sm:$0xff] %v1076_v53 }
 0x116   : > { %1409 = shalt.err (!%p1406_p5)
}
 0x117   : > { %s1410_s4 = scalar_lea.hbm %s2552_s8, 4096  ;;  %s1414_s22 = scalar_lea.hbm %s2607_s3, 8192 }
 0x118   : > { %p1411_p9 = scmp.ne.s32.totalorder %s2552_s8, %s1410_s4  ;;  %p1415_p3 = scmp.lt.u32.totalorder %s2552_s8, %s2607_s3 }
 0x119   : > { %p1416_p7 = scmp.lt.u32.totalorder %s1414_s22, %s1410_s4  ;;  %p1418_p4 = scmp.lt.u32.totalorder %s1410_s4, %s2552_s8 }
 0x11a   : > { %p1412_p1 = pnand %p1411_p9, %p1610_p10 }
 0x11b   : > { %p1417_p13 = por %p1416_p7, %p1415_p3 }
 0x11c   : > { %p1413_p2 = pneg %p1412_p1 }
 0x11d   : > { %p1419_p6 = por %p1418_p4, %p1417_p13 }
 0x11f   : > { %p1420_p8 = pnand %p1419_p6, %p1413_p2 }
 0x121   : > { %1423 = shalt.err (!%p1420_p8)
}
 0x122   : > { %s1492_s10 = smov 128   ;;  %s1493_s11 = smov 8  }
 0x123   : > { %1260 = dma.vmem_to_hbm [thread:$0]  (%p1610_p10), %s2554_s18, 4096, %s2552_s8, %s1110_s21, %s1492_s10, %s1492_s10, %s1493_s11  }
 0x124 PF: > { %s1139_s26 = sand.u32 1, %s1462_s12   ;;  %p2637_p12 = scmp.ne.s32.totalorder %s2621_s23, 0 }
 0x125   : > { %p2638_p11 = scmp.ge.s32.totalorder %s1482_s17, 2  ;;  %s1140_s7 = scalar_lea.sflag [#allocation5], %s1139_s26 }
 0x127   : > { %p1271_p0 = pnand %p2638_p11, %p2637_p12 }
 0x129   : > { %1457 = dma.done.wait (!%p1271_p0), %s1140_s7, 4096  }
 0x12a   : > { %1459 = vsyncadd (!%p1271_p0), %s1140_s7, 4294963200  ;;  %s20_s17 = sadd.s32 1, %s1482_s17   ;;  %s2639_s12 = smov %s1466_s13 }
 0x12b   : > { %p17_p5 = scmp.ge.s32.totalorder %s20_s17, 4   ;;  %s2640_s13 = smov %s1470_s14 }
 0x12c   : > { %s2641_s14 = smov %s1619_s5  ;;  %s2642_s15 = smov %s1478_s16 }
 0x12d   : > { %s2643_s16 = smov %s2645_s28  ;;  %19 = sbr.rel (!%p17_p5) target bundleno = 7 (0x7), region = 87 }
 0x134   :  { %1145 = vsyncpa [#allocation4], 1 }
 0x135   :  { %1147 = vsyncpa [#allocation4 + $0x1], 1 }
 0x136   :  { %1148 = vsyncpa [#allocation7], 1 }
 0x137   :  { %1149 = vsyncpa [#allocation5], 1 }
 0x138   :  { %1151 = vsyncpa [#allocation5 + $0x1], 1 }

</bundles_post_ra>
